<compile_context>
chip_gen: v7x
topology: tpu7x:2x2x1
jax: 0.10.0
libtpu: 0.0.40
codegen_flags: <defaults>
</compile_context>

<pallas_src>
import math

import jax
import jax.numpy as jnp
from jax.experimental import pallas as pl
from jax.experimental.pallas import tpu as pltpu


def _round_up(n, m):
    return ((n + m - 1) // m) * m


def _make_fused_lstm_kernel(num_layers, T, Bp, H, chunk_sizes):
    """Single-invocation kernel: all layers x all timesteps, weights resident in VMEM.

    chunk_sizes: static list of time-chunk lengths summing to T (gx buffer sized for max).
    Gate order inside the kernel is [i, f, o, g] (reordered in the wrapper)."""
    n3h = 3 * H

    def kernel(*refs):
        # inputs: x2d, h0, c0, then (wihT_bf16, whhT_bf16, b_f32) per layer
        x_ref, h0_ref, c0_ref = refs[0], refs[1], refs[2]
        w_refs = refs[3:3 + 3 * num_layers]
        y_ref, hn_ref, cn_ref = refs[3 + 3 * num_layers:6 + 3 * num_layers]
        gx_sc, h_sc, c_sc = refs[6 + 3 * num_layers:]

        for layer in range(num_layers):
            wihT = w_refs[3 * layer + 0][...]        # (Din, 4H) bf16, resident
            whhT = w_refs[3 * layer + 1][...]        # (H, 4H)   bf16, resident
            b = w_refs[3 * layer + 2][...]           # (1, 4H)   f32 (b_ih + b_hh)

            h_sc[...] = h0_ref[layer].astype(jnp.float32)
            c_sc[...] = c0_ref[layer].astype(jnp.float32)

            t0 = 0
            for tc in chunk_sizes:
                # ---- hoisted input projection for this time chunk: one tall bf16 MXU
                # matmul with f32 accumulation. Layer 0 reads the (padded, flattened)
                # input; layer l>0 reads the previous layer's output still sitting in
                # y_ref (VMEM) -- those rows are only overwritten *after* gx is computed.
                rows = pl.ds(t0 * Bp, tc * Bp)                  # static, sublane-aligned
                src = x_ref[rows, :] if layer == 0 else y_ref[rows, :]
                gx_sc[pl.ds(0, tc * Bp), :] = (
                    jnp.dot(src.astype(jnp.bfloat16), wihT,
                            preferred_element_type=jnp.float32)
                    + b
                )

                # ---- serial recurrence; unrolled within the (capped) chunk ----
                for t in range(tc):
                    row = pl.ds(t * Bp, Bp)
                    gates = gx_sc[row, :] + jnp.dot(
                        h_sc[...].astype(jnp.bfloat16), whhT,
                        preferred_element_type=jnp.float32)
                    # gate order [i, f, o, g]: sigmoid only on the first 3H lanes.
                    sg = jax.nn.sigmoid(gates[:, :n3h])
                    i_g = sg[:, 0 * H:1 * H]
                    f_g = sg[:, 1 * H:2 * H]
                    o_g = sg[:, 2 * H:n3h]
                    g_g = jnp.tanh(gates[:, n3h:])
                    c_new = f_g * c_sc[...] + i_g * g_g
                    h_new = o_g * jnp.tanh(c_new)
                    c_sc[...] = c_new
                    h_sc[...] = h_new
                    y_ref[pl.ds((t0 + t) * Bp, Bp), :] = h_new.astype(y_ref.dtype)

                t0 += tc

            hn_ref[layer] = h_sc[...].astype(hn_ref.dtype)
            cn_ref[layer] = c_sc[...].astype(cn_ref.dtype)

    return kernel


def fused_lstm(x_tbf, params_t, h0, c0):
    """x_tbf: (T, B, F) f32. params_t: [(W_ih^T bf16, W_hh^T bf16, b f32 (1,4H))]*L
    with gate columns already reordered to [i, f, o, g]. h0,c0: (L, B, H) f32.

    Returns y (T, B, H), h_n (L, B, H), c_n (L, B, H)."""
    T, B, F = x_tbf.shape
    L = len(params_t)
    H = params_t[0][1].shape[0]
    dtype = x_tbf.dtype

    Bp = max(8, _round_up(B, 8))        # pad batch so per-step slices are sublane-aligned
    pad_b = Bp - B

    x_p = jnp.pad(x_tbf, ((0, 0), (0, pad_b), (0, 0)))
    x2d = x_p.reshape(T * Bp, F)                         # flatten outside the kernel (free)
    h0_p = jnp.pad(h0, ((0, 0), (0, pad_b), (0, 0)))
    c0_p = jnp.pad(c0, ((0, 0), (0, pad_b), (0, 0)))

    flat_w = []
    for (wihT, whhT, b2d) in params_t:
        flat_w += [wihT, whhT, b2d]

    # Time-chunk the hoisted gate buffer so gx stays well under v7x VMEM at large T.
    gx_budget = 4 << 20                                   # ~4 MiB for the gx scratch
    tc_max = max(1, min(T, gx_budget // (Bp * 4 * H * 4)))
    chunk_sizes = []
    rem = T
    while rem > 0:
        c = min(tc_max, rem)
        chunk_sizes.append(c)
        rem -= c

    n_in = 3 + 3 * L
    vmem_spec = pl.BlockSpec(memory_space=pltpu.MemorySpace.VMEM)

    out_shapes = (
        jax.ShapeDtypeStruct((T * Bp, H), dtype),        # y (also inter-layer buffer)
        jax.ShapeDtypeStruct((L, Bp, H), dtype),         # h_n
        jax.ShapeDtypeStruct((L, Bp, H), dtype),         # c_n
    )

    # Explicit VMEM budget: resident inputs/outputs/weights/scratch + generous margin.
    resident = (x2d.size * x2d.dtype.itemsize
                + 2 * L * Bp * H * 4                      # h0, c0
                + sum(a.size * a.dtype.itemsize for a in flat_w)
                + T * Bp * H * 4 + 2 * L * Bp * H * 4     # y, hn, cn
                + tc_max * Bp * 4 * H * 4                 # gx scratch
                + 2 * Bp * H * 4)                         # h, c carries
    vmem_limit = int(min(100 << 20, max(3 * resident + (4 << 20), 16 << 20)))

    kernel = _make_fused_lstm_kernel(L, T, Bp, H, chunk_sizes)

    y2d, hn, cn = pl.pallas_call(
        kernel,
        out_shape=out_shapes,
        in_specs=[vmem_spec] * n_in,
        out_specs=(vmem_spec, vmem_spec, vmem_spec),
        scratch_shapes=[
            pltpu.VMEM((tc_max * Bp, 4 * H), jnp.float32),   # hoisted input-proj gates
            pltpu.VMEM((Bp, H), jnp.float32),                # h carry
            pltpu.VMEM((Bp, H), jnp.float32),                # c carry
        ],
        compiler_params=pltpu.CompilerParams(vmem_limit_bytes=vmem_limit),
    )(x2d, h0_p, c0_p, *flat_w)

    y = y2d.reshape(T, Bp, H)[:, :B, :]
    return y, hn[:, :B, :], cn[:, :B, :]


def init_tsm_lstm_params(key, number_of_features, hidden_size, num_layers,
                         dtype=jnp.float32):
    """Deterministic init matching nn.LSTM shapes: U(-1/sqrt(H), 1/sqrt(H)).

    Returns list of (w_ih (4H,Din), w_hh (4H,H), b = b_ih + b_hh (4H,)) in the
    native PyTorch gate order [i, f, g, o]."""
    params = []
    bound = 1.0 / math.sqrt(hidden_size)
    for layer in range(num_layers):
        din = number_of_features if layer == 0 else hidden_size
        key, k1, k2, k3, k4 = jax.random.split(key, 5)
        w_ih = jax.random.uniform(k1, (4 * hidden_size, din), dtype, -bound, bound)
        w_hh = jax.random.uniform(k2, (4 * hidden_size, hidden_size), dtype, -bound, bound)
        b_ih = jax.random.uniform(k3, (4 * hidden_size,), dtype, -bound, bound)
        b_hh = jax.random.uniform(k4, (4 * hidden_size,), dtype, -bound, bound)
        params.append((w_ih, w_hh, b_ih + b_hh))
    return params


def _reorder_ifog(m, H):
    """Permute gate blocks from PyTorch [i, f, g, o] to kernel [i, f, o, g]."""
    return jnp.concatenate([m[:2 * H], m[3 * H:4 * H], m[2 * H:3 * H]], axis=0)


def tsm_lstm_forward(x, params, state_override=None):
    """
    x: (B, number_of_features, T)  (matches the PyTorch module's input layout)
    params: list of (w_ih (4H,Din), w_hh (4H,H), b (4H,)) in PyTorch gate order.
    returns: output (B, H, T), (h_n list of (1,B,H), c_n list of (1,B,H))
    """
    B, F, T = x.shape
    L = len(params)
    H = params[0][1].shape[1]

    # Pre-process weights ONCE (trace time): reorder gates to [i,f,o,g], transpose so
    # 4H is the lane axis, cast matmul operands to bf16 (bias stays f32, it is added
    # elementwise).
    params_t = []
    for (w_ih, w_hh, b) in params:
        w_ih_r = _reorder_ifog(w_ih, H)
        w_hh_r = _reorder_ifog(w_hh, H)
        b_r = _reorder_ifog(b, H)
        params_t.append((w_ih_r.T.astype(jnp.bfloat16),
                         w_hh_r.T.astype(jnp.bfloat16),
                         b_r.reshape(1, -1).astype(jnp.float32)))

    xt = jnp.transpose(x, (2, 0, 1))                     # (T, B, F) time-major

    if state_override is not None:
        h0 = jnp.concatenate([s[0] for s in state_override], axis=0)   # (L, B, H)
        c0 = jnp.concatenate([s[1] for s in state_override], axis=0)
    else:
        h0 = jnp.zeros((L, B, H), x.dtype)
        c0 = jnp.zeros((L, B, H), x.dtype)

    y, hn, cn = fused_lstm(xt, params_t, h0, c0)

    output = jnp.transpose(y, (1, 2, 0))                 # (B, H, T)
    h_list = [hn[l][None] for l in range(L)]             # matches unsqueeze(0)
    c_list = [cn[l][None] for l in range(L)]
    return output, (h_list, c_list)


def _lstm_reference(x, params, h0, c0, mxu_dtype=jnp.float32):
    """Pure-JAX multi-layer LSTM reference (PyTorch gate order / semantics).

    mxu_dtype=bfloat16 mimics the kernel's bf16-operand / f32-accumulate matmuls."""
    xt = jnp.transpose(x, (2, 0, 1))                     # (T, B, F)
    cur = xt
    hns, cns = [], []
    for (w_ih, w_hh, b), h_init, c_init in zip(params, h0, c0):
        H = w_hh.shape[1]
        wihT = w_ih.T.astype(mxu_dtype)
        whhT = w_hh.T.astype(mxu_dtype)

        def step(carry, x_t, wihT=wihT, whhT=whhT, b=b, H=H):
            h, c = carry
            g = (jnp.dot(x_t.astype(mxu_dtype), wihT, preferred_element_type=jnp.float32)
                 + jnp.dot(h.astype(mxu_dtype), whhT, preferred_element_type=jnp.float32)
                 + b)
            i = jax.nn.sigmoid(g[:, 0 * H:1 * H])
            f = jax.nn.sigmoid(g[:, 1 * H:2 * H])
            gg = jnp.tanh(g[:, 2 * H:3 * H])
            o = jax.nn.sigmoid(g[:, 3 * H:4 * H])
            c2 = f * c + i * gg
            h2 = o * jnp.tanh(c2)
            return (h2, c2), h2

        (hn, cn), ys = jax.lax.scan(step, (h_init, c_init), cur)
        cur = ys
        hns.append(hn)
        cns.append(cn)
    return jnp.transpose(cur, (1, 2, 0)), jnp.stack(hns), jnp.stack(cns)


if __name__ == "__main__":
    # TSM_LSTM(number_of_features=4, hidden_features_per_layer=[32, 32], dropout=0.0)
    B, F, T = 2, 4, 8
    H, L = 32, 2

    key = jax.random.PRNGKey(0)
    kx, kp = jax.random.split(key)
    x = jax.random.normal(kx, (B, F, T), jnp.float32)

    params = init_tsm_lstm_params(kp, F, H, L, jnp.float32)

    output, (h_n, c_n) = tsm_lstm_forward(x, params)
    jax.block_until_ready(output)
    for h in h_n:
        jax.block_until_ready(h)
    for c in c_n:
        jax.block_until_ready(c)

    assert output.shape == (B, H, T)
    assert len(h_n) == L and h_n[0].shape == (1, B, H)
    assert len(c_n) == L and c_n[0].shape == (1, B, H)

    h0 = jnp.zeros((L, B, H), jnp.float32)
    c0 = jnp.zeros((L, B, H), jnp.float32)

    # Tight check against a reference that matches the kernel's bf16-operand matmuls.
    out_r16, hn_r16, cn_r16 = _lstm_reference(x, params, h0, c0, mxu_dtype=jnp.bfloat16)
    assert bool(jnp.allclose(output, out_r16, atol=1e-4, rtol=1e-3))
    assert bool(jnp.allclose(jnp.concatenate(h_n, 0), hn_r16, atol=1e-4, rtol=1e-3))
    assert bool(jnp.allclose(jnp.concatenate(c_n, 0), cn_r16, atol=1e-4, rtol=1e-3))

    # Loose check against the pure-f32 reference (bounds bf16-MXU precision loss).
    out_r32, hn_r32, cn_r32 = _lstm_reference(x, params, h0, c0, mxu_dtype=jnp.float32)
    assert bool(jnp.allclose(output, out_r32, atol=3e-2, rtol=3e-2))
    assert bool(jnp.allclose(jnp.concatenate(h_n, 0), hn_r32, atol=3e-2, rtol=3e-2))
    assert bool(jnp.allclose(jnp.concatenate(c_n, 0), cn_r32, atol=3e-2, rtol=3e-2))

    # h_n of last layer equals last timestep of output (same values from the kernel).
    assert bool(jnp.allclose(h_n[-1][0], output[:, :, -1], atol=1e-6))

    print("KERNEL_OK")
</pallas_src>

<mosaic_0001>
module attributes {stable_mosaic.version = 11 : i64} {
  func.func @kernel(%arg0: memref<64x4xf32, #tpu.memory_space<vmem>>, %arg1: memref<2x8x32xf32, #tpu.memory_space<vmem>>, %arg2: memref<2x8x32xf32, #tpu.memory_space<vmem>>, %arg3: memref<4x128xbf16, #tpu.memory_space<vmem>>, %arg4: memref<32x128xbf16, #tpu.memory_space<vmem>>, %arg5: memref<1x128xf32, #tpu.memory_space<vmem>>, %arg6: memref<32x128xbf16, #tpu.memory_space<vmem>>, %arg7: memref<32x128xbf16, #tpu.memory_space<vmem>>, %arg8: memref<1x128xf32, #tpu.memory_space<vmem>>, %arg9: memref<64x32xf32, #tpu.memory_space<vmem>>, %arg10: memref<2x8x32xf32, #tpu.memory_space<vmem>>, %arg11: memref<2x8x32xf32, #tpu.memory_space<vmem>>, %arg12: memref<64x128xf32, #tpu.memory_space<vmem>>, %arg13: memref<8x32xf32, #tpu.memory_space<vmem>>, %arg14: memref<8x32xf32, #tpu.memory_space<vmem>>) attributes {dimension_semantics = [], scalar_prefetch = 0 : i64, scratch_operands = 3 : i64, tpu.core_type = #tpu.core_type<tc>} {
    %c0 = arith.constant 0 : index
    %c0_0 = arith.constant 0 : index
    %0 = vector.load %arg3[%c0, %c0_0] : memref<4x128xbf16, #tpu.memory_space<vmem>>, vector<4x128xbf16>
    %c0_1 = arith.constant 0 : index
    %c0_2 = arith.constant 0 : index
    %1 = vector.load %arg4[%c0_1, %c0_2] : memref<32x128xbf16, #tpu.memory_space<vmem>>, vector<32x128xbf16>
    %c0_3 = arith.constant 0 : index
    %c0_4 = arith.constant 0 : index
    %2 = vector.load %arg5[%c0_3, %c0_4] : memref<1x128xf32, #tpu.memory_space<vmem>>, vector<1x128xf32>
    %c0_5 = arith.constant 0 : index
    %c0_6 = arith.constant 0 : index
    %c0_7 = arith.constant 0 : index
    %3 = vector.load %arg1[%c0_5, %c0_6, %c0_7] : memref<2x8x32xf32, #tpu.memory_space<vmem>>, vector<1x8x32xf32>
    %4 = vector.shape_cast %3 : vector<1x8x32xf32> to vector<8x32xf32>
    %c0_8 = arith.constant 0 : index
    %c0_9 = arith.constant 0 : index
    %5 = vector.load %arg13[%c0_8, %c0_9] : memref<8x32xf32, #tpu.memory_space<vmem>>, vector<8x32xf32>
    tpu.vector_store %arg13[%c0_8, %c0_9], %4 {strides = array<i32>} : memref<8x32xf32, #tpu.memory_space<vmem>>, vector<8x32xf32>,
    %c0_10 = arith.constant 0 : index
    %c0_11 = arith.constant 0 : index
    %c0_12 = arith.constant 0 : index
    %6 = vector.load %arg2[%c0_10, %c0_11, %c0_12] : memref<2x8x32xf32, #tpu.memory_space<vmem>>, vector<1x8x32xf32>
    %7 = vector.shape_cast %6 : vector<1x8x32xf32> to vector<8x32xf32>
    %c0_13 = arith.constant 0 : index
    %c0_14 = arith.constant 0 : index
    %8 = vector.load %arg14[%c0_13, %c0_14] : memref<8x32xf32, #tpu.memory_space<vmem>>, vector<8x32xf32>
    tpu.vector_store %arg14[%c0_13, %c0_14], %7 {strides = array<i32>} : memref<8x32xf32, #tpu.memory_space<vmem>>, vector<8x32xf32>,
    %c0_15 = arith.constant 0 : index
    %c0_16 = arith.constant 0 : index
    %9 = vector.load %arg0[%c0_15, %c0_16] : memref<64x4xf32, #tpu.memory_space<vmem>>, vector<64x4xf32>
    %10 = arith.truncf %9 : vector<64x4xf32> to vector<64x4xbf16>
    %cst = arith.constant dense<0.000000e+00> : vector<64x128xf32>
    %11 = tpu.matmul %10, %0, %cst {dimension_numbers = #tpu.dot_dimension_numbers<[1], [0], [0], [1], [0, 0, 1, 1], [], []>} : vector<64x4xbf16>, vector<4x128xbf16>, vector<64x128xf32> -> vector<64x128xf32>
    %12 = vector.broadcast %2 : vector<1x128xf32> to vector<64x128xf32>
    %13 = arith.addf %11, %12 : vector<64x128xf32>
    %c0_17 = arith.constant 0 : index
    %c0_18 = arith.constant 0 : index
    %14 = vector.load %arg12[%c0_17, %c0_18] : memref<64x128xf32, #tpu.memory_space<vmem>>, vector<64x128xf32>
    tpu.vector_store %arg12[%c0_17, %c0_18], %13 {strides = array<i32>} : memref<64x128xf32, #tpu.memory_space<vmem>>, vector<64x128xf32>,
    %c0_19 = arith.constant 0 : index
    %c0_20 = arith.constant 0 : index
    %15 = vector.load %arg12[%c0_19, %c0_20] : memref<64x128xf32, #tpu.memory_space<vmem>>, vector<8x128xf32>
    %c0_21 = arith.constant 0 : index
    %c0_22 = arith.constant 0 : index
    %16 = vector.load %arg13[%c0_21, %c0_22] : memref<8x32xf32, #tpu.memory_space<vmem>>, vector<8x32xf32>
    %17 = arith.truncf %16 : vector<8x32xf32> to vector<8x32xbf16>
    %cst_23 = arith.constant dense<0.000000e+00> : vector<8x128xf32>
    %18 = tpu.matmul %17, %1, %cst_23 {dimension_numbers = #tpu.dot_dimension_numbers<[1], [0], [0], [1], [0, 0, 1, 1], [], []>} : vector<8x32xbf16>, vector<32x128xbf16>, vector<8x128xf32> -> vector<8x128xf32>
    %19 = arith.addf %15, %18 : vector<8x128xf32>
    %20 = vector.extract_strided_slice %19 {offsets = [0, 0], sizes = [8, 96], strides = [1, 1]} : vector<8x128xf32> to vector<8x96xf32>
    %21 = arith.negf %20 : vector<8x96xf32>
    %22 = math.exp %21 : vector<8x96xf32>
    %cst_24 = arith.constant 1.000000e+00 : f32
    %23 = vector.broadcast %cst_24 : f32 to vector<8x96xf32>
    %24 = arith.addf %23, %22 : vector<8x96xf32>
    %25 = arith.divf %23, %24 : vector<8x96xf32>
    %26 = vector.extract_strided_slice %25 {offsets = [0, 0], sizes = [8, 32], strides = [1, 1]} : vector<8x96xf32> to vector<8x32xf32>
    %27 = vector.extract_strided_slice %25 {offsets = [0, 32], sizes = [8, 32], strides = [1, 1]} : vector<8x96xf32> to vector<8x32xf32>
    %28 = vector.extract_strided_slice %25 {offsets = [0, 64], sizes = [8, 32], strides = [1, 1]} : vector<8x96xf32> to vector<8x32xf32>
    %29 = vector.extract_strided_slice %19 {offsets = [0, 96], sizes = [8, 32], strides = [1, 1]} : vector<8x128xf32> to vector<8x32xf32>
    %30 = math.tanh %29 : vector<8x32xf32>
    %c0_25 = arith.constant 0 : index
    %c0_26 = arith.constant 0 : index
    %31 = vector.load %arg14[%c0_25, %c0_26] : memref<8x32xf32, #tpu.memory_space<vmem>>, vector<8x32xf32>
    %32 = arith.mulf %27, %31 : vector<8x32xf32>
    %33 = arith.mulf %26, %30 : vector<8x32xf32>
    %34 = arith.addf %32, %33 : vector<8x32xf32>
    %35 = math.tanh %34 : vector<8x32xf32>
    %36 = arith.mulf %28, %35 : vector<8x32xf32>
    %c0_27 = arith.constant 0 : index
    %c0_28 = arith.constant 0 : index
    %37 = vector.load %arg14[%c0_27, %c0_28] : memref<8x32xf32, #tpu.memory_space<vmem>>, vector<8x32xf32>
    tpu.vector_store %arg14[%c0_27, %c0_28], %34 {strides = array<i32>} : memref<8x32xf32, #tpu.memory_space<vmem>>, vector<8x32xf32>,
    %c0_29 = arith.constant 0 : index
    %c0_30 = arith.constant 0 : index
    %38 = vector.load %arg13[%c0_29, %c0_30] : memref<8x32xf32, #tpu.memory_space<vmem>>, vector<8x32xf32>
    tpu.vector_store %arg13[%c0_29, %c0_30], %36 {strides = array<i32>} : memref<8x32xf32, #tpu.memory_space<vmem>>, vector<8x32xf32>,
    %c0_31 = arith.constant 0 : index
    %c0_32 = arith.constant 0 : index
    %39 = vector.load %arg9[%c0_31, %c0_32] : memref<64x32xf32, #tpu.memory_space<vmem>>, vector<8x32xf32>
    tpu.vector_store %arg9[%c0_31, %c0_32], %36 {strides = array<i32>} : memref<64x32xf32, #tpu.memory_space<vmem>>, vector<8x32xf32>,
    %c8 = arith.constant 8 : index
    %c0_33 = arith.constant 0 : index
    %40 = vector.load %arg12[%c8, %c0_33] : memref<64x128xf32, #tpu.memory_space<vmem>>, vector<8x128xf32>
    %c0_34 = arith.constant 0 : index
    %c0_35 = arith.constant 0 : index
    %41 = vector.load %arg13[%c0_34, %c0_35] : memref<8x32xf32, #tpu.memory_space<vmem>>, vector<8x32xf32>
    %42 = arith.truncf %41 : vector<8x32xf32> to vector<8x32xbf16>
    %cst_36 = arith.constant dense<0.000000e+00> : vector<8x128xf32>
    %43 = tpu.matmul %42, %1, %cst_36 {dimension_numbers = #tpu.dot_dimension_numbers<[1], [0], [0], [1], [0, 0, 1, 1], [], []>} : vector<8x32xbf16>, vector<32x128xbf16>, vector<8x128xf32> -> vector<8x128xf32>
    %44 = arith.addf %40, %43 : vector<8x128xf32>
    %45 = vector.extract_strided_slice %44 {offsets = [0, 0], sizes = [8, 96], strides = [1, 1]} : vector<8x128xf32> to vector<8x96xf32>
    %46 = arith.negf %45 : vector<8x96xf32>
    %47 = math.exp %46 : vector<8x96xf32>
    %cst_37 = arith.constant 1.000000e+00 : f32
    %48 = vector.broadcast %cst_37 : f32 to vector<8x96xf32>
    %49 = arith.addf %48, %47 : vector<8x96xf32>
    %50 = arith.divf %48, %49 : vector<8x96xf32>
    %51 = vector.extract_strided_slice %50 {offsets = [0, 0], sizes = [8, 32], strides = [1, 1]} : vector<8x96xf32> to vector<8x32xf32>
    %52 = vector.extract_strided_slice %50 {offsets = [0, 32], sizes = [8, 32], strides = [1, 1]} : vector<8x96xf32> to vector<8x32xf32>
    %53 = vector.extract_strided_slice %50 {offsets = [0, 64], sizes = [8, 32], strides = [1, 1]} : vector<8x96xf32> to vector<8x32xf32>
    %54 = vector.extract_strided_slice %44 {offsets = [0, 96], sizes = [8, 32], strides = [1, 1]} : vector<8x128xf32> to vector<8x32xf32>
    %55 = math.tanh %54 : vector<8x32xf32>
    %c0_38 = arith.constant 0 : index
    %c0_39 = arith.constant 0 : index
    %56 = vector.load %arg14[%c0_38, %c0_39] : memref<8x32xf32, #tpu.memory_space<vmem>>, vector<8x32xf32>
    %57 = arith.mulf %52, %56 : vector<8x32xf32>
    %58 = arith.mulf %51, %55 : vector<8x32xf32>
    %59 = arith.addf %57, %58 : vector<8x32xf32>
    %60 = math.tanh %59 : vector<8x32xf32>
    %61 = arith.mulf %53, %60 : vector<8x32xf32>
    %c0_40 = arith.constant 0 : index
    %c0_41 = arith.constant 0 : index
    %62 = vector.load %arg14[%c0_40, %c0_41] : memref<8x32xf32, #tpu.memory_space<vmem>>, vector<8x32xf32>
    tpu.vector_store %arg14[%c0_40, %c0_41], %59 {strides = array<i32>} : memref<8x32xf32, #tpu.memory_space<vmem>>, vector<8x32xf32>,
    %c0_42 = arith.constant 0 : index
    %c0_43 = arith.constant 0 : index
    %63 = vector.load %arg13[%c0_42, %c0_43] : memref<8x32xf32, #tpu.memory_space<vmem>>, vector<8x32xf32>
    tpu.vector_store %arg13[%c0_42, %c0_43], %61 {strides = array<i32>} : memref<8x32xf32, #tpu.memory_space<vmem>>, vector<8x32xf32>,
    %c8_44 = arith.constant 8 : index
    %c0_45 = arith.constant 0 : index
    %64 = vector.load %arg9[%c8_44, %c0_45] : memref<64x32xf32, #tpu.memory_space<vmem>>, vector<8x32xf32>
    tpu.vector_store %arg9[%c8_44, %c0_45], %61 {strides = array<i32>} : memref<64x32xf32, #tpu.memory_space<vmem>>, vector<8x32xf32>,
    %c16 = arith.constant 16 : index
    %c0_46 = arith.constant 0 : index
    %65 = vector.load %arg12[%c16, %c0_46] : memref<64x128xf32, #tpu.memory_space<vmem>>, vector<8x128xf32>
    %c0_47 = arith.constant 0 : index
    %c0_48 = arith.constant 0 : index
    %66 = vector.load %arg13[%c0_47, %c0_48] : memref<8x32xf32, #tpu.memory_space<vmem>>, vector<8x32xf32>
    %67 = arith.truncf %66 : vector<8x32xf32> to vector<8x32xbf16>
    %cst_49 = arith.constant dense<0.000000e+00> : vector<8x128xf32>
    %68 = tpu.matmul %67, %1, %cst_49 {dimension_numbers = #tpu.dot_dimension_numbers<[1], [0], [0], [1], [0, 0, 1, 1], [], []>} : vector<8x32xbf16>, vector<32x128xbf16>, vector<8x128xf32> -> vector<8x128xf32>
    %69 = arith.addf %65, %68 : vector<8x128xf32>
    %70 = vector.extract_strided_slice %69 {offsets = [0, 0], sizes = [8, 96], strides = [1, 1]} : vector<8x128xf32> to vector<8x96xf32>
    %71 = arith.negf %70 : vector<8x96xf32>
    %72 = math.exp %71 : vector<8x96xf32>
    %cst_50 = arith.constant 1.000000e+00 : f32
    %73 = vector.broadcast %cst_50 : f32 to vector<8x96xf32>
    %74 = arith.addf %73, %72 : vector<8x96xf32>
    %75 = arith.divf %73, %74 : vector<8x96xf32>
    %76 = vector.extract_strided_slice %75 {offsets = [0, 0], sizes = [8, 32], strides = [1, 1]} : vector<8x96xf32> to vector<8x32xf32>
    %77 = vector.extract_strided_slice %75 {offsets = [0, 32], sizes = [8, 32], strides = [1, 1]} : vector<8x96xf32> to vector<8x32xf32>
    %78 = vector.extract_strided_slice %75 {offsets = [0, 64], sizes = [8, 32], strides = [1, 1]} : vector<8x96xf32> to vector<8x32xf32>
    %79 = vector.extract_strided_slice %69 {offsets = [0, 96], sizes = [8, 32], strides = [1, 1]} : vector<8x128xf32> to vector<8x32xf32>
    %80 = math.tanh %79 : vector<8x32xf32>
    %c0_51 = arith.constant 0 : index
    %c0_52 = arith.constant 0 : index
    %81 = vector.load %arg14[%c0_51, %c0_52] : memref<8x32xf32, #tpu.memory_space<vmem>>, vector<8x32xf32>
    %82 = arith.mulf %77, %81 : vector<8x32xf32>
    %83 = arith.mulf %76, %80 : vector<8x32xf32>
    %84 = arith.addf %82, %83 : vector<8x32xf32>
    %85 = math.tanh %84 : vector<8x32xf32>
    %86 = arith.mulf %78, %85 : vector<8x32xf32>
    %c0_53 = arith.constant 0 : index
    %c0_54 = arith.constant 0 : index
    %87 = vector.load %arg14[%c0_53, %c0_54] : memref<8x32xf32, #tpu.memory_space<vmem>>, vector<8x32xf32>
    tpu.vector_store %arg14[%c0_53, %c0_54], %84 {strides = array<i32>} : memref<8x32xf32, #tpu.memory_space<vmem>>, vector<8x32xf32>,
    %c0_55 = arith.constant 0 : index
    %c0_56 = arith.constant 0 : index
    %88 = vector.load %arg13[%c0_55, %c0_56] : memref<8x32xf32, #tpu.memory_space<vmem>>, vector<8x32xf32>
    tpu.vector_store %arg13[%c0_55, %c0_56], %86 {strides = array<i32>} : memref<8x32xf32, #tpu.memory_space<vmem>>, vector<8x32xf32>,
    %c16_57 = arith.constant 16 : index
    %c0_58 = arith.constant 0 : index
    %89 = vector.load %arg9[%c16_57, %c0_58] : memref<64x32xf32, #tpu.memory_space<vmem>>, vector<8x32xf32>
    tpu.vector_store %arg9[%c16_57, %c0_58], %86 {strides = array<i32>} : memref<64x32xf32, #tpu.memory_space<vmem>>, vector<8x32xf32>,
    %c24 = arith.constant 24 : index
    %c0_59 = arith.constant 0 : index
    %90 = vector.load %arg12[%c24, %c0_59] : memref<64x128xf32, #tpu.memory_space<vmem>>, vector<8x128xf32>
    %c0_60 = arith.constant 0 : index
    %c0_61 = arith.constant 0 : index
    %91 = vector.load %arg13[%c0_60, %c0_61] : memref<8x32xf32, #tpu.memory_space<vmem>>, vector<8x32xf32>
    %92 = arith.truncf %91 : vector<8x32xf32> to vector<8x32xbf16>
    %cst_62 = arith.constant dense<0.000000e+00> : vector<8x128xf32>
    %93 = tpu.matmul %92, %1, %cst_62 {dimension_numbers = #tpu.dot_dimension_numbers<[1], [0], [0], [1], [0, 0, 1, 1], [], []>} : vector<8x32xbf16>, vector<32x128xbf16>, vector<8x128xf32> -> vector<8x128xf32>
    %94 = arith.addf %90, %93 : vector<8x128xf32>
    %95 = vector.extract_strided_slice %94 {offsets = [0, 0], sizes = [8, 96], strides = [1, 1]} : vector<8x128xf32> to vector<8x96xf32>
    %96 = arith.negf %95 : vector<8x96xf32>
    %97 = math.exp %96 : vector<8x96xf32>
    %cst_63 = arith.constant 1.000000e+00 : f32
    %98 = vector.broadcast %cst_63 : f32 to vector<8x96xf32>
    %99 = arith.addf %98, %97 : vector<8x96xf32>
    %100 = arith.divf %98, %99 : vector<8x96xf32>
    %101 = vector.extract_strided_slice %100 {offsets = [0, 0], sizes = [8, 32], strides = [1, 1]} : vector<8x96xf32> to vector<8x32xf32>
    %102 = vector.extract_strided_slice %100 {offsets = [0, 32], sizes = [8, 32], strides = [1, 1]} : vector<8x96xf32> to vector<8x32xf32>
    %103 = vector.extract_strided_slice %100 {offsets = [0, 64], sizes = [8, 32], strides = [1, 1]} : vector<8x96xf32> to vector<8x32xf32>
    %104 = vector.extract_strided_slice %94 {offsets = [0, 96], sizes = [8, 32], strides = [1, 1]} : vector<8x128xf32> to vector<8x32xf32>
    %105 = math.tanh %104 : vector<8x32xf32>
    %c0_64 = arith.constant 0 : index
    %c0_65 = arith.constant 0 : index
    %106 = vector.load %arg14[%c0_64, %c0_65] : memref<8x32xf32, #tpu.memory_space<vmem>>, vector<8x32xf32>
    %107 = arith.mulf %102, %106 : vector<8x32xf32>
    %108 = arith.mulf %101, %105 : vector<8x32xf32>
    %109 = arith.addf %107, %108 : vector<8x32xf32>
    %110 = math.tanh %109 : vector<8x32xf32>
    %111 = arith.mulf %103, %110 : vector<8x32xf32>
    %c0_66 = arith.constant 0 : index
    %c0_67 = arith.constant 0 : index
    %112 = vector.load %arg14[%c0_66, %c0_67] : memref<8x32xf32, #tpu.memory_space<vmem>>, vector<8x32xf32>
    tpu.vector_store %arg14[%c0_66, %c0_67], %109 {strides = array<i32>} : memref<8x32xf32, #tpu.memory_space<vmem>>, vector<8x32xf32>,
    %c0_68 = arith.constant 0 : index
    %c0_69 = arith.constant 0 : index
    %113 = vector.load %arg13[%c0_68, %c0_69] : memref<8x32xf32, #tpu.memory_space<vmem>>, vector<8x32xf32>
    tpu.vector_store %arg13[%c0_68, %c0_69], %111 {strides = array<i32>} : memref<8x32xf32, #tpu.memory_space<vmem>>, vector<8x32xf32>,
    %c24_70 = arith.constant 24 : index
    %c0_71 = arith.constant 0 : index
    %114 = vector.load %arg9[%c24_70, %c0_71] : memref<64x32xf32, #tpu.memory_space<vmem>>, vector<8x32xf32>
    tpu.vector_store %arg9[%c24_70, %c0_71], %111 {strides = array<i32>} : memref<64x32xf32, #tpu.memory_space<vmem>>, vector<8x32xf32>,
    %c32 = arith.constant 32 : index
    %c0_72 = arith.constant 0 : index
    %115 = vector.load %arg12[%c32, %c0_72] : memref<64x128xf32, #tpu.memory_space<vmem>>, vector<8x128xf32>
    %c0_73 = arith.constant 0 : index
    %c0_74 = arith.constant 0 : index
    %116 = vector.load %arg13[%c0_73, %c0_74] : memref<8x32xf32, #tpu.memory_space<vmem>>, vector<8x32xf32>
    %117 = arith.truncf %116 : vector<8x32xf32> to vector<8x32xbf16>
    %cst_75 = arith.constant dense<0.000000e+00> : vector<8x128xf32>
    %118 = tpu.matmul %117, %1, %cst_75 {dimension_numbers = #tpu.dot_dimension_numbers<[1], [0], [0], [1], [0, 0, 1, 1], [], []>} : vector<8x32xbf16>, vector<32x128xbf16>, vector<8x128xf32> -> vector<8x128xf32>
    %119 = arith.addf %115, %118 : vector<8x128xf32>
    %120 = vector.extract_strided_slice %119 {offsets = [0, 0], sizes = [8, 96], strides = [1, 1]} : vector<8x128xf32> to vector<8x96xf32>
    %121 = arith.negf %120 : vector<8x96xf32>
    %122 = math.exp %121 : vector<8x96xf32>
    %cst_76 = arith.constant 1.000000e+00 : f32
    %123 = vector.broadcast %cst_76 : f32 to vector<8x96xf32>
    %124 = arith.addf %123, %122 : vector<8x96xf32>
    %125 = arith.divf %123, %124 : vector<8x96xf32>
    %126 = vector.extract_strided_slice %125 {offsets = [0, 0], sizes = [8, 32], strides = [1, 1]} : vector<8x96xf32> to vector<8x32xf32>
    %127 = vector.extract_strided_slice %125 {offsets = [0, 32], sizes = [8, 32], strides = [1, 1]} : vector<8x96xf32> to vector<8x32xf32>
    %128 = vector.extract_strided_slice %125 {offsets = [0, 64], sizes = [8, 32], strides = [1, 1]} : vector<8x96xf32> to vector<8x32xf32>
    %129 = vector.extract_strided_slice %119 {offsets = [0, 96], sizes = [8, 32], strides = [1, 1]} : vector<8x128xf32> to vector<8x32xf32>
    %130 = math.tanh %129 : vector<8x32xf32>
    %c0_77 = arith.constant 0 : index
    %c0_78 = arith.constant 0 : index
    %131 = vector.load %arg14[%c0_77, %c0_78] : memref<8x32xf32, #tpu.memory_space<vmem>>, vector<8x32xf32>
    %132 = arith.mulf %127, %131 : vector<8x32xf32>
    %133 = arith.mulf %126, %130 : vector<8x32xf32>
    %134 = arith.addf %132, %133 : vector<8x32xf32>
    %135 = math.tanh %134 : vector<8x32xf32>
    %136 = arith.mulf %128, %135 : vector<8x32xf32>
    %c0_79 = arith.constant 0 : index
    %c0_80 = arith.constant 0 : index
    %137 = vector.load %arg14[%c0_79, %c0_80] : memref<8x32xf32, #tpu.memory_space<vmem>>, vector<8x32xf32>
    tpu.vector_store %arg14[%c0_79, %c0_80], %134 {strides = array<i32>} : memref<8x32xf32, #tpu.memory_space<vmem>>, vector<8x32xf32>,
    %c0_81 = arith.constant 0 : index
    %c0_82 = arith.constant 0 : index
    %138 = vector.load %arg13[%c0_81, %c0_82] : memref<8x32xf32, #tpu.memory_space<vmem>>, vector<8x32xf32>
    tpu.vector_store %arg13[%c0_81, %c0_82], %136 {strides = array<i32>} : memref<8x32xf32, #tpu.memory_space<vmem>>, vector<8x32xf32>,
    %c32_83 = arith.constant 32 : index
    %c0_84 = arith.constant 0 : index
    %139 = vector.load %arg9[%c32_83, %c0_84] : memref<64x32xf32, #tpu.memory_space<vmem>>, vector<8x32xf32>
    tpu.vector_store %arg9[%c32_83, %c0_84], %136 {strides = array<i32>} : memref<64x32xf32, #tpu.memory_space<vmem>>, vector<8x32xf32>,
    %c40 = arith.constant 40 : index
    %c0_85 = arith.constant 0 : index
    %140 = vector.load %arg12[%c40, %c0_85] : memref<64x128xf32, #tpu.memory_space<vmem>>, vector<8x128xf32>
    %c0_86 = arith.constant 0 : index
    %c0_87 = arith.constant 0 : index
    %141 = vector.load %arg13[%c0_86, %c0_87] : memref<8x32xf32, #tpu.memory_space<vmem>>, vector<8x32xf32>
    %142 = arith.truncf %141 : vector<8x32xf32> to vector<8x32xbf16>
    %cst_88 = arith.constant dense<0.000000e+00> : vector<8x128xf32>
    %143 = tpu.matmul %142, %1, %cst_88 {dimension_numbers = #tpu.dot_dimension_numbers<[1], [0], [0], [1], [0, 0, 1, 1], [], []>} : vector<8x32xbf16>, vector<32x128xbf16>, vector<8x128xf32> -> vector<8x128xf32>
    %144 = arith.addf %140, %143 : vector<8x128xf32>
    %145 = vector.extract_strided_slice %144 {offsets = [0, 0], sizes = [8, 96], strides = [1, 1]} : vector<8x128xf32> to vector<8x96xf32>
    %146 = arith.negf %145 : vector<8x96xf32>
    %147 = math.exp %146 : vector<8x96xf32>
    %cst_89 = arith.constant 1.000000e+00 : f32
    %148 = vector.broadcast %cst_89 : f32 to vector<8x96xf32>
    %149 = arith.addf %148, %147 : vector<8x96xf32>
    %150 = arith.divf %148, %149 : vector<8x96xf32>
    %151 = vector.extract_strided_slice %150 {offsets = [0, 0], sizes = [8, 32], strides = [1, 1]} : vector<8x96xf32> to vector<8x32xf32>
    %152 = vector.extract_strided_slice %150 {offsets = [0, 32], sizes = [8, 32], strides = [1, 1]} : vector<8x96xf32> to vector<8x32xf32>
    %153 = vector.extract_strided_slice %150 {offsets = [0, 64], sizes = [8, 32], strides = [1, 1]} : vector<8x96xf32> to vector<8x32xf32>
    %154 = vector.extract_strided_slice %144 {offsets = [0, 96], sizes = [8, 32], strides = [1, 1]} : vector<8x128xf32> to vector<8x32xf32>
    %155 = math.tanh %154 : vector<8x32xf32>
    %c0_90 = arith.constant 0 : index
    %c0_91 = arith.constant 0 : index
    %156 = vector.load %arg14[%c0_90, %c0_91] : memref<8x32xf32, #tpu.memory_space<vmem>>, vector<8x32xf32>
    %157 = arith.mulf %152, %156 : vector<8x32xf32>
    %158 = arith.mulf %151, %155 : vector<8x32xf32>
    %159 = arith.addf %157, %158 : vector<8x32xf32>
    %160 = math.tanh %159 : vector<8x32xf32>
    %161 = arith.mulf %153, %160 : vector<8x32xf32>
    %c0_92 = arith.constant 0 : index
    %c0_93 = arith.constant 0 : index
    %162 = vector.load %arg14[%c0_92, %c0_93] : memref<8x32xf32, #tpu.memory_space<vmem>>, vector<8x32xf32>
    tpu.vector_store %arg14[%c0_92, %c0_93], %159 {strides = array<i32>} : memref<8x32xf32, #tpu.memory_space<vmem>>, vector<8x32xf32>,
    %c0_94 = arith.constant 0 : index
    %c0_95 = arith.constant 0 : index
    %163 = vector.load %arg13[%c0_94, %c0_95] : memref<8x32xf32, #tpu.memory_space<vmem>>, vector<8x32xf32>
    tpu.vector_store %arg13[%c0_94, %c0_95], %161 {strides = array<i32>} : memref<8x32xf32, #tpu.memory_space<vmem>>, vector<8x32xf32>,
    %c40_96 = arith.constant 40 : index
    %c0_97 = arith.constant 0 : index
    %164 = vector.load %arg9[%c40_96, %c0_97] : memref<64x32xf32, #tpu.memory_space<vmem>>, vector<8x32xf32>
    tpu.vector_store %arg9[%c40_96, %c0_97], %161 {strides = array<i32>} : memref<64x32xf32, #tpu.memory_space<vmem>>, vector<8x32xf32>,
    %c48 = arith.constant 48 : index
    %c0_98 = arith.constant 0 : index
    %165 = vector.load %arg12[%c48, %c0_98] : memref<64x128xf32, #tpu.memory_space<vmem>>, vector<8x128xf32>
    %c0_99 = arith.constant 0 : index
    %c0_100 = arith.constant 0 : index
    %166 = vector.load %arg13[%c0_99, %c0_100] : memref<8x32xf32, #tpu.memory_space<vmem>>, vector<8x32xf32>
    %167 = arith.truncf %166 : vector<8x32xf32> to vector<8x32xbf16>
    %cst_101 = arith.constant dense<0.000000e+00> : vector<8x128xf32>
    %168 = tpu.matmul %167, %1, %cst_101 {dimension_numbers = #tpu.dot_dimension_numbers<[1], [0], [0], [1], [0, 0, 1, 1], [], []>} : vector<8x32xbf16>, vector<32x128xbf16>, vector<8x128xf32> -> vector<8x128xf32>
    %169 = arith.addf %165, %168 : vector<8x128xf32>
    %170 = vector.extract_strided_slice %169 {offsets = [0, 0], sizes = [8, 96], strides = [1, 1]} : vector<8x128xf32> to vector<8x96xf32>
    %171 = arith.negf %170 : vector<8x96xf32>
    %172 = math.exp %171 : vector<8x96xf32>
    %cst_102 = arith.constant 1.000000e+00 : f32
    %173 = vector.broadcast %cst_102 : f32 to vector<8x96xf32>
    %174 = arith.addf %173, %172 : vector<8x96xf32>
    %175 = arith.divf %173, %174 : vector<8x96xf32>
    %176 = vector.extract_strided_slice %175 {offsets = [0, 0], sizes = [8, 32], strides = [1, 1]} : vector<8x96xf32> to vector<8x32xf32>
    %177 = vector.extract_strided_slice %175 {offsets = [0, 32], sizes = [8, 32], strides = [1, 1]} : vector<8x96xf32> to vector<8x32xf32>
    %178 = vector.extract_strided_slice %175 {offsets = [0, 64], sizes = [8, 32], strides = [1, 1]} : vector<8x96xf32> to vector<8x32xf32>
    %179 = vector.extract_strided_slice %169 {offsets = [0, 96], sizes = [8, 32], strides = [1, 1]} : vector<8x128xf32> to vector<8x32xf32>
    %180 = math.tanh %179 : vector<8x32xf32>
    %c0_103 = arith.constant 0 : index
    %c0_104 = arith.constant 0 : index
    %181 = vector.load %arg14[%c0_103, %c0_104] : memref<8x32xf32, #tpu.memory_space<vmem>>, vector<8x32xf32>
    %182 = arith.mulf %177, %181 : vector<8x32xf32>
    %183 = arith.mulf %176, %180 : vector<8x32xf32>
    %184 = arith.addf %182, %183 : vector<8x32xf32>
    %185 = math.tanh %184 : vector<8x32xf32>
    %186 = arith.mulf %178, %185 : vector<8x32xf32>
    %c0_105 = arith.constant 0 : index
    %c0_106 = arith.constant 0 : index
    %187 = vector.load %arg14[%c0_105, %c0_106] : memref<8x32xf32, #tpu.memory_space<vmem>>, vector<8x32xf32>
    tpu.vector_store %arg14[%c0_105, %c0_106], %184 {strides = array<i32>} : memref<8x32xf32, #tpu.memory_space<vmem>>, vector<8x32xf32>,
    %c0_107 = arith.constant 0 : index
    %c0_108 = arith.constant 0 : index
    %188 = vector.load %arg13[%c0_107, %c0_108] : memref<8x32xf32, #tpu.memory_space<vmem>>, vector<8x32xf32>
    tpu.vector_store %arg13[%c0_107, %c0_108], %186 {strides = array<i32>} : memref<8x32xf32, #tpu.memory_space<vmem>>, vector<8x32xf32>,
    %c48_109 = arith.constant 48 : index
    %c0_110 = arith.constant 0 : index
    %189 = vector.load %arg9[%c48_109, %c0_110] : memref<64x32xf32, #tpu.memory_space<vmem>>, vector<8x32xf32>
    tpu.vector_store %arg9[%c48_109, %c0_110], %186 {strides = array<i32>} : memref<64x32xf32, #tpu.memory_space<vmem>>, vector<8x32xf32>,
    %c56 = arith.constant 56 : index
    %c0_111 = arith.constant 0 : index
    %190 = vector.load %arg12[%c56, %c0_111] : memref<64x128xf32, #tpu.memory_space<vmem>>, vector<8x128xf32>
    %c0_112 = arith.constant 0 : index
    %c0_113 = arith.constant 0 : index
    %191 = vector.load %arg13[%c0_112, %c0_113] : memref<8x32xf32, #tpu.memory_space<vmem>>, vector<8x32xf32>
    %192 = arith.truncf %191 : vector<8x32xf32> to vector<8x32xbf16>
    %cst_114 = arith.constant dense<0.000000e+00> : vector<8x128xf32>
    %193 = tpu.matmul %192, %1, %cst_114 {dimension_numbers = #tpu.dot_dimension_numbers<[1], [0], [0], [1], [0, 0, 1, 1], [], []>} : vector<8x32xbf16>, vector<32x128xbf16>, vector<8x128xf32> -> vector<8x128xf32>
    %194 = arith.addf %190, %193 : vector<8x128xf32>
    %195 = vector.extract_strided_slice %194 {offsets = [0, 0], sizes = [8, 96], strides = [1, 1]} : vector<8x128xf32> to vector<8x96xf32>
    %196 = arith.negf %195 : vector<8x96xf32>
    %197 = math.exp %196 : vector<8x96xf32>
    %cst_115 = arith.constant 1.000000e+00 : f32
    %198 = vector.broadcast %cst_115 : f32 to vector<8x96xf32>
    %199 = arith.addf %198, %197 : vector<8x96xf32>
    %200 = arith.divf %198, %199 : vector<8x96xf32>
    %201 = vector.extract_strided_slice %200 {offsets = [0, 0], sizes = [8, 32], strides = [1, 1]} : vector<8x96xf32> to vector<8x32xf32>
    %202 = vector.extract_strided_slice %200 {offsets = [0, 32], sizes = [8, 32], strides = [1, 1]} : vector<8x96xf32> to vector<8x32xf32>
    %203 = vector.extract_strided_slice %200 {offsets = [0, 64], sizes = [8, 32], strides = [1, 1]} : vector<8x96xf32> to vector<8x32xf32>
    %204 = vector.extract_strided_slice %194 {offsets = [0, 96], sizes = [8, 32], strides = [1, 1]} : vector<8x128xf32> to vector<8x32xf32>
    %205 = math.tanh %204 : vector<8x32xf32>
    %c0_116 = arith.constant 0 : index
    %c0_117 = arith.constant 0 : index
    %206 = vector.load %arg14[%c0_116, %c0_117] : memref<8x32xf32, #tpu.memory_space<vmem>>, vector<8x32xf32>
    %207 = arith.mulf %202, %206 : vector<8x32xf32>
    %208 = arith.mulf %201, %205 : vector<8x32xf32>
    %209 = arith.addf %207, %208 : vector<8x32xf32>
    %210 = math.tanh %209 : vector<8x32xf32>
    %211 = arith.mulf %203, %210 : vector<8x32xf32>
    %c0_118 = arith.constant 0 : index
    %c0_119 = arith.constant 0 : index
    %212 = vector.load %arg14[%c0_118, %c0_119] : memref<8x32xf32, #tpu.memory_space<vmem>>, vector<8x32xf32>
    tpu.vector_store %arg14[%c0_118, %c0_119], %209 {strides = array<i32>} : memref<8x32xf32, #tpu.memory_space<vmem>>, vector<8x32xf32>,
    %c0_120 = arith.constant 0 : index
    %c0_121 = arith.constant 0 : index
    %213 = vector.load %arg13[%c0_120, %c0_121] : memref<8x32xf32, #tpu.memory_space<vmem>>, vector<8x32xf32>
    tpu.vector_store %arg13[%c0_120, %c0_121], %211 {strides = array<i32>} : memref<8x32xf32, #tpu.memory_space<vmem>>, vector<8x32xf32>,
    %c56_122 = arith.constant 56 : index
    %c0_123 = arith.constant 0 : index
    %214 = vector.load %arg9[%c56_122, %c0_123] : memref<64x32xf32, #tpu.memory_space<vmem>>, vector<8x32xf32>
    tpu.vector_store %arg9[%c56_122, %c0_123], %211 {strides = array<i32>} : memref<64x32xf32, #tpu.memory_space<vmem>>, vector<8x32xf32>,
    %c0_124 = arith.constant 0 : index
    %c0_125 = arith.constant 0 : index
    %215 = vector.load %arg13[%c0_124, %c0_125] : memref<8x32xf32, #tpu.memory_space<vmem>>, vector<8x32xf32>
    %c0_126 = arith.constant 0 : index
    %c0_127 = arith.constant 0 : index
    %c0_128 = arith.constant 0 : index
    %216 = vector.load %arg10[%c0_126, %c0_127, %c0_128] : memref<2x8x32xf32, #tpu.memory_space<vmem>>, vector<1x8x32xf32>
    %217 = vector.shape_cast %216 : vector<1x8x32xf32> to vector<8x32xf32>
    %218 = vector.shape_cast %215 : vector<8x32xf32> to vector<1x8x32xf32>
    tpu.vector_store %arg10[%c0_126, %c0_127, %c0_128], %218 {strides = array<i32>} : memref<2x8x32xf32, #tpu.memory_space<vmem>>, vector<1x8x32xf32>,
    %c0_129 = arith.constant 0 : index
    %c0_130 = arith.constant 0 : index
    %219 = vector.load %arg14[%c0_129, %c0_130] : memref<8x32xf32, #tpu.memory_space<vmem>>, vector<8x32xf32>
    %c0_131 = arith.constant 0 : index
    %c0_132 = arith.constant 0 : index
    %c0_133 = arith.constant 0 : index
    %220 = vector.load %arg11[%c0_131, %c0_132, %c0_133] : memref<2x8x32xf32, #tpu.memory_space<vmem>>, vector<1x8x32xf32>
    %221 = vector.shape_cast %220 : vector<1x8x32xf32> to vector<8x32xf32>
    %222 = vector.shape_cast %219 : vector<8x32xf32> to vector<1x8x32xf32>
    tpu.vector_store %arg11[%c0_131, %c0_132, %c0_133], %222 {strides = array<i32>} : memref<2x8x32xf32, #tpu.memory_space<vmem>>, vector<1x8x32xf32>,
    %c0_134 = arith.constant 0 : index
    %c0_135 = arith.constant 0 : index
    %223 = vector.load %arg6[%c0_134, %c0_135] : memref<32x128xbf16, #tpu.memory_space<vmem>>, vector<32x128xbf16>
    %c0_136 = arith.constant 0 : index
    %c0_137 = arith.constant 0 : index
    %224 = vector.load %arg7[%c0_136, %c0_137] : memref<32x128xbf16, #tpu.memory_space<vmem>>, vector<32x128xbf16>
    %c0_138 = arith.constant 0 : index
    %c0_139 = arith.constant 0 : index
    %225 = vector.load %arg8[%c0_138, %c0_139] : memref<1x128xf32, #tpu.memory_space<vmem>>, vector<1x128xf32>
    %c1 = arith.constant 1 : index
    %c0_140 = arith.constant 0 : index
    %c0_141 = arith.constant 0 : index
    %226 = vector.load %arg1[%c1, %c0_140, %c0_141] : memref<2x8x32xf32, #tpu.memory_space<vmem>>, vector<1x8x32xf32>
    %227 = vector.shape_cast %226 : vector<1x8x32xf32> to vector<8x32xf32>
    %c0_142 = arith.constant 0 : index
    %c0_143 = arith.constant 0 : index
    %228 = vector.load %arg13[%c0_142, %c0_143] : memref<8x32xf32, #tpu.memory_space<vmem>>, vector<8x32xf32>
    tpu.vector_store %arg13[%c0_142, %c0_143], %227 {strides = array<i32>} : memref<8x32xf32, #tpu.memory_space<vmem>>, vector<8x32xf32>,
    %c1_144 = arith.constant 1 : index
    %c0_145 = arith.constant 0 : index
    %c0_146 = arith.constant 0 : index
    %229 = vector.load %arg2[%c1_144, %c0_145, %c0_146] : memref<2x8x32xf32, #tpu.memory_space<vmem>>, vector<1x8x32xf32>
    %230 = vector.shape_cast %229 : vector<1x8x32xf32> to vector<8x32xf32>
    %c0_147 = arith.constant 0 : index
    %c0_148 = arith.constant 0 : index
    %231 = vector.load %arg14[%c0_147, %c0_148] : memref<8x32xf32, #tpu.memory_space<vmem>>, vector<8x32xf32>
    tpu.vector_store %arg14[%c0_147, %c0_148], %230 {strides = array<i32>} : memref<8x32xf32, #tpu.memory_space<vmem>>, vector<8x32xf32>,
    %c0_149 = arith.constant 0 : index
    %c0_150 = arith.constant 0 : index
    %232 = vector.load %arg9[%c0_149, %c0_150] : memref<64x32xf32, #tpu.memory_space<vmem>>, vector<64x32xf32>
    %233 = arith.truncf %232 : vector<64x32xf32> to vector<64x32xbf16>
    %cst_151 = arith.constant dense<0.000000e+00> : vector<64x128xf32>
    %234 = tpu.matmul %233, %223, %cst_151 {dimension_numbers = #tpu.dot_dimension_numbers<[1], [0], [0], [1], [0, 0, 1, 1], [], []>} : vector<64x32xbf16>, vector<32x128xbf16>, vector<64x128xf32> -> vector<64x128xf32>
    %235 = vector.broadcast %225 : vector<1x128xf32> to vector<64x128xf32>
    %236 = arith.addf %234, %235 : vector<64x128xf32>
    %c0_152 = arith.constant 0 : index
    %c0_153 = arith.constant 0 : index
    %237 = vector.load %arg12[%c0_152, %c0_153] : memref<64x128xf32, #tpu.memory_space<vmem>>, vector<64x128xf32>
    tpu.vector_store %arg12[%c0_152, %c0_153], %236 {strides = array<i32>} : memref<64x128xf32, #tpu.memory_space<vmem>>, vector<64x128xf32>,
    %c0_154 = arith.constant 0 : index
    %c0_155 = arith.constant 0 : index
    %238 = vector.load %arg12[%c0_154, %c0_155] : memref<64x128xf32, #tpu.memory_space<vmem>>, vector<8x128xf32>
    %c0_156 = arith.constant 0 : index
    %c0_157 = arith.constant 0 : index
    %239 = vector.load %arg13[%c0_156, %c0_157] : memref<8x32xf32, #tpu.memory_space<vmem>>, vector<8x32xf32>
    %240 = arith.truncf %239 : vector<8x32xf32> to vector<8x32xbf16>
    %cst_158 = arith.constant dense<0.000000e+00> : vector<8x128xf32>
    %241 = tpu.matmul %240, %224, %cst_158 {dimension_numbers = #tpu.dot_dimension_numbers<[1], [0], [0], [1], [0, 0, 1, 1], [], []>} : vector<8x32xbf16>, vector<32x128xbf16>, vector<8x128xf32> -> vector<8x128xf32>
    %242 = arith.addf %238, %241 : vector<8x128xf32>
    %243 = vector.extract_strided_slice %242 {offsets = [0, 0], sizes = [8, 96], strides = [1, 1]} : vector<8x128xf32> to vector<8x96xf32>
    %244 = arith.negf %243 : vector<8x96xf32>
    %245 = math.exp %244 : vector<8x96xf32>
    %cst_159 = arith.constant 1.000000e+00 : f32
    %246 = vector.broadcast %cst_159 : f32 to vector<8x96xf32>
    %247 = arith.addf %246, %245 : vector<8x96xf32>
    %248 = arith.divf %246, %247 : vector<8x96xf32>
    %249 = vector.extract_strided_slice %248 {offsets = [0, 0], sizes = [8, 32], strides = [1, 1]} : vector<8x96xf32> to vector<8x32xf32>
    %250 = vector.extract_strided_slice %248 {offsets = [0, 32], sizes = [8, 32], strides = [1, 1]} : vector<8x96xf32> to vector<8x32xf32>
    %251 = vector.extract_strided_slice %248 {offsets = [0, 64], sizes = [8, 32], strides = [1, 1]} : vector<8x96xf32> to vector<8x32xf32>
    %252 = vector.extract_strided_slice %242 {offsets = [0, 96], sizes = [8, 32], strides = [1, 1]} : vector<8x128xf32> to vector<8x32xf32>
    %253 = math.tanh %252 : vector<8x32xf32>
    %c0_160 = arith.constant 0 : index
    %c0_161 = arith.constant 0 : index
    %254 = vector.load %arg14[%c0_160, %c0_161] : memref<8x32xf32, #tpu.memory_space<vmem>>, vector<8x32xf32>
    %255 = arith.mulf %250, %254 : vector<8x32xf32>
    %256 = arith.mulf %249, %253 : vector<8x32xf32>
    %257 = arith.addf %255, %256 : vector<8x32xf32>
    %258 = math.tanh %257 : vector<8x32xf32>
    %259 = arith.mulf %251, %258 : vector<8x32xf32>
    %c0_162 = arith.constant 0 : index
    %c0_163 = arith.constant 0 : index
    %260 = vector.load %arg14[%c0_162, %c0_163] : memref<8x32xf32, #tpu.memory_space<vmem>>, vector<8x32xf32>
    tpu.vector_store %arg14[%c0_162, %c0_163], %257 {strides = array<i32>} : memref<8x32xf32, #tpu.memory_space<vmem>>, vector<8x32xf32>,
    %c0_164 = arith.constant 0 : index
    %c0_165 = arith.constant 0 : index
    %261 = vector.load %arg13[%c0_164, %c0_165] : memref<8x32xf32, #tpu.memory_space<vmem>>, vector<8x32xf32>
    tpu.vector_store %arg13[%c0_164, %c0_165], %259 {strides = array<i32>} : memref<8x32xf32, #tpu.memory_space<vmem>>, vector<8x32xf32>,
    %c0_166 = arith.constant 0 : index
    %c0_167 = arith.constant 0 : index
    %262 = vector.load %arg9[%c0_166, %c0_167] : memref<64x32xf32, #tpu.memory_space<vmem>>, vector<8x32xf32>
    tpu.vector_store %arg9[%c0_166, %c0_167], %259 {strides = array<i32>} : memref<64x32xf32, #tpu.memory_space<vmem>>, vector<8x32xf32>,
    %c8_168 = arith.constant 8 : index
    %c0_169 = arith.constant 0 : index
    %263 = vector.load %arg12[%c8_168, %c0_169] : memref<64x128xf32, #tpu.memory_space<vmem>>, vector<8x128xf32>
    %c0_170 = arith.constant 0 : index
    %c0_171 = arith.constant 0 : index
    %264 = vector.load %arg13[%c0_170, %c0_171] : memref<8x32xf32, #tpu.memory_space<vmem>>, vector<8x32xf32>
    %265 = arith.truncf %264 : vector<8x32xf32> to vector<8x32xbf16>
    %cst_172 = arith.constant dense<0.000000e+00> : vector<8x128xf32>
    %266 = tpu.matmul %265, %224, %cst_172 {dimension_numbers = #tpu.dot_dimension_numbers<[1], [0], [0], [1], [0, 0, 1, 1], [], []>} : vector<8x32xbf16>, vector<32x128xbf16>, vector<8x128xf32> -> vector<8x128xf32>
    %267 = arith.addf %263, %266 : vector<8x128xf32>
    %268 = vector.extract_strided_slice %267 {offsets = [0, 0], sizes = [8, 96], strides = [1, 1]} : vector<8x128xf32> to vector<8x96xf32>
    %269 = arith.negf %268 : vector<8x96xf32>
    %270 = math.exp %269 : vector<8x96xf32>
    %cst_173 = arith.constant 1.000000e+00 : f32
    %271 = vector.broadcast %cst_173 : f32 to vector<8x96xf32>
    %272 = arith.addf %271, %270 : vector<8x96xf32>
    %273 = arith.divf %271, %272 : vector<8x96xf32>
    %274 = vector.extract_strided_slice %273 {offsets = [0, 0], sizes = [8, 32], strides = [1, 1]} : vector<8x96xf32> to vector<8x32xf32>
    %275 = vector.extract_strided_slice %273 {offsets = [0, 32], sizes = [8, 32], strides = [1, 1]} : vector<8x96xf32> to vector<8x32xf32>
    %276 = vector.extract_strided_slice %273 {offsets = [0, 64], sizes = [8, 32], strides = [1, 1]} : vector<8x96xf32> to vector<8x32xf32>
    %277 = vector.extract_strided_slice %267 {offsets = [0, 96], sizes = [8, 32], strides = [1, 1]} : vector<8x128xf32> to vector<8x32xf32>
    %278 = math.tanh %277 : vector<8x32xf32>
    %c0_174 = arith.constant 0 : index
    %c0_175 = arith.constant 0 : index
    %279 = vector.load %arg14[%c0_174, %c0_175] : memref<8x32xf32, #tpu.memory_space<vmem>>, vector<8x32xf32>
    %280 = arith.mulf %275, %279 : vector<8x32xf32>
    %281 = arith.mulf %274, %278 : vector<8x32xf32>
    %282 = arith.addf %280, %281 : vector<8x32xf32>
    %283 = math.tanh %282 : vector<8x32xf32>
    %284 = arith.mulf %276, %283 : vector<8x32xf32>
    %c0_176 = arith.constant 0 : index
    %c0_177 = arith.constant 0 : index
    %285 = vector.load %arg14[%c0_176, %c0_177] : memref<8x32xf32, #tpu.memory_space<vmem>>, vector<8x32xf32>
    tpu.vector_store %arg14[%c0_176, %c0_177], %282 {strides = array<i32>} : memref<8x32xf32, #tpu.memory_space<vmem>>, vector<8x32xf32>,
    %c0_178 = arith.constant 0 : index
    %c0_179 = arith.constant 0 : index
    %286 = vector.load %arg13[%c0_178, %c0_179] : memref<8x32xf32, #tpu.memory_space<vmem>>, vector<8x32xf32>
    tpu.vector_store %arg13[%c0_178, %c0_179], %284 {strides = array<i32>} : memref<8x32xf32, #tpu.memory_space<vmem>>, vector<8x32xf32>,
    %c8_180 = arith.constant 8 : index
    %c0_181 = arith.constant 0 : index
    %287 = vector.load %arg9[%c8_180, %c0_181] : memref<64x32xf32, #tpu.memory_space<vmem>>, vector<8x32xf32>
    tpu.vector_store %arg9[%c8_180, %c0_181], %284 {strides = array<i32>} : memref<64x32xf32, #tpu.memory_space<vmem>>, vector<8x32xf32>,
    %c16_182 = arith.constant 16 : index
    %c0_183 = arith.constant 0 : index
    %288 = vector.load %arg12[%c16_182, %c0_183] : memref<64x128xf32, #tpu.memory_space<vmem>>, vector<8x128xf32>
    %c0_184 = arith.constant 0 : index
    %c0_185 = arith.constant 0 : index
    %289 = vector.load %arg13[%c0_184, %c0_185] : memref<8x32xf32, #tpu.memory_space<vmem>>, vector<8x32xf32>
    %290 = arith.truncf %289 : vector<8x32xf32> to vector<8x32xbf16>
    %cst_186 = arith.constant dense<0.000000e+00> : vector<8x128xf32>
    %291 = tpu.matmul %290, %224, %cst_186 {dimension_numbers = #tpu.dot_dimension_numbers<[1], [0], [0], [1], [0, 0, 1, 1], [], []>} : vector<8x32xbf16>, vector<32x128xbf16>, vector<8x128xf32> -> vector<8x128xf32>
    %292 = arith.addf %288, %291 : vector<8x128xf32>
    %293 = vector.extract_strided_slice %292 {offsets = [0, 0], sizes = [8, 96], strides = [1, 1]} : vector<8x128xf32> to vector<8x96xf32>
    %294 = arith.negf %293 : vector<8x96xf32>
    %295 = math.exp %294 : vector<8x96xf32>
    %cst_187 = arith.constant 1.000000e+00 : f32
    %296 = vector.broadcast %cst_187 : f32 to vector<8x96xf32>
    %297 = arith.addf %296, %295 : vector<8x96xf32>
    %298 = arith.divf %296, %297 : vector<8x96xf32>
    %299 = vector.extract_strided_slice %298 {offsets = [0, 0], sizes = [8, 32], strides = [1, 1]} : vector<8x96xf32> to vector<8x32xf32>
    %300 = vector.extract_strided_slice %298 {offsets = [0, 32], sizes = [8, 32], strides = [1, 1]} : vector<8x96xf32> to vector<8x32xf32>
    %301 = vector.extract_strided_slice %298 {offsets = [0, 64], sizes = [8, 32], strides = [1, 1]} : vector<8x96xf32> to vector<8x32xf32>
    %302 = vector.extract_strided_slice %292 {offsets = [0, 96], sizes = [8, 32], strides = [1, 1]} : vector<8x128xf32> to vector<8x32xf32>
    %303 = math.tanh %302 : vector<8x32xf32>
    %c0_188 = arith.constant 0 : index
    %c0_189 = arith.constant 0 : index
    %304 = vector.load %arg14[%c0_188, %c0_189] : memref<8x32xf32, #tpu.memory_space<vmem>>, vector<8x32xf32>
    %305 = arith.mulf %300, %304 : vector<8x32xf32>
    %306 = arith.mulf %299, %303 : vector<8x32xf32>
    %307 = arith.addf %305, %306 : vector<8x32xf32>
    %308 = math.tanh %307 : vector<8x32xf32>
    %309 = arith.mulf %301, %308 : vector<8x32xf32>
    %c0_190 = arith.constant 0 : index
    %c0_191 = arith.constant 0 : index
    %310 = vector.load %arg14[%c0_190, %c0_191] : memref<8x32xf32, #tpu.memory_space<vmem>>, vector<8x32xf32>
    tpu.vector_store %arg14[%c0_190, %c0_191], %307 {strides = array<i32>} : memref<8x32xf32, #tpu.memory_space<vmem>>, vector<8x32xf32>,
    %c0_192 = arith.constant 0 : index
    %c0_193 = arith.constant 0 : index
    %311 = vector.load %arg13[%c0_192, %c0_193] : memref<8x32xf32, #tpu.memory_space<vmem>>, vector<8x32xf32>
    tpu.vector_store %arg13[%c0_192, %c0_193], %309 {strides = array<i32>} : memref<8x32xf32, #tpu.memory_space<vmem>>, vector<8x32xf32>,
    %c16_194 = arith.constant 16 : index
    %c0_195 = arith.constant 0 : index
    %312 = vector.load %arg9[%c16_194, %c0_195] : memref<64x32xf32, #tpu.memory_space<vmem>>, vector<8x32xf32>
    tpu.vector_store %arg9[%c16_194, %c0_195], %309 {strides = array<i32>} : memref<64x32xf32, #tpu.memory_space<vmem>>, vector<8x32xf32>,
    %c24_196 = arith.constant 24 : index
    %c0_197 = arith.constant 0 : index
    %313 = vector.load %arg12[%c24_196, %c0_197] : memref<64x128xf32, #tpu.memory_space<vmem>>, vector<8x128xf32>
    %c0_198 = arith.constant 0 : index
    %c0_199 = arith.constant 0 : index
    %314 = vector.load %arg13[%c0_198, %c0_199] : memref<8x32xf32, #tpu.memory_space<vmem>>, vector<8x32xf32>
    %315 = arith.truncf %314 : vector<8x32xf32> to vector<8x32xbf16>
    %cst_200 = arith.constant dense<0.000000e+00> : vector<8x128xf32>
    %316 = tpu.matmul %315, %224, %cst_200 {dimension_numbers = #tpu.dot_dimension_numbers<[1], [0], [0], [1], [0, 0, 1, 1], [], []>} : vector<8x32xbf16>, vector<32x128xbf16>, vector<8x128xf32> -> vector<8x128xf32>
    %317 = arith.addf %313, %316 : vector<8x128xf32>
    %318 = vector.extract_strided_slice %317 {offsets = [0, 0], sizes = [8, 96], strides = [1, 1]} : vector<8x128xf32> to vector<8x96xf32>
    %319 = arith.negf %318 : vector<8x96xf32>
    %320 = math.exp %319 : vector<8x96xf32>
    %cst_201 = arith.constant 1.000000e+00 : f32
    %321 = vector.broadcast %cst_201 : f32 to vector<8x96xf32>
    %322 = arith.addf %321, %320 : vector<8x96xf32>
    %323 = arith.divf %321, %322 : vector<8x96xf32>
    %324 = vector.extract_strided_slice %323 {offsets = [0, 0], sizes = [8, 32], strides = [1, 1]} : vector<8x96xf32> to vector<8x32xf32>
    %325 = vector.extract_strided_slice %323 {offsets = [0, 32], sizes = [8, 32], strides = [1, 1]} : vector<8x96xf32> to vector<8x32xf32>
    %326 = vector.extract_strided_slice %323 {offsets = [0, 64], sizes = [8, 32], strides = [1, 1]} : vector<8x96xf32> to vector<8x32xf32>
    %327 = vector.extract_strided_slice %317 {offsets = [0, 96], sizes = [8, 32], strides = [1, 1]} : vector<8x128xf32> to vector<8x32xf32>
    %328 = math.tanh %327 : vector<8x32xf32>
    %c0_202 = arith.constant 0 : index
    %c0_203 = arith.constant 0 : index
    %329 = vector.load %arg14[%c0_202, %c0_203] : memref<8x32xf32, #tpu.memory_space<vmem>>, vector<8x32xf32>
    %330 = arith.mulf %325, %329 : vector<8x32xf32>
    %331 = arith.mulf %324, %328 : vector<8x32xf32>
    %332 = arith.addf %330, %331 : vector<8x32xf32>
    %333 = math.tanh %332 : vector<8x32xf32>
    %334 = arith.mulf %326, %333 : vector<8x32xf32>
    %c0_204 = arith.constant 0 : index
    %c0_205 = arith.constant 0 : index
    %335 = vector.load %arg14[%c0_204, %c0_205] : memref<8x32xf32, #tpu.memory_space<vmem>>, vector<8x32xf32>
    tpu.vector_store %arg14[%c0_204, %c0_205], %332 {strides = array<i32>} : memref<8x32xf32, #tpu.memory_space<vmem>>, vector<8x32xf32>,
    %c0_206 = arith.constant 0 : index
    %c0_207 = arith.constant 0 : index
    %336 = vector.load %arg13[%c0_206, %c0_207] : memref<8x32xf32, #tpu.memory_space<vmem>>, vector<8x32xf32>
    tpu.vector_store %arg13[%c0_206, %c0_207], %334 {strides = array<i32>} : memref<8x32xf32, #tpu.memory_space<vmem>>, vector<8x32xf32>,
    %c24_208 = arith.constant 24 : index
    %c0_209 = arith.constant 0 : index
    %337 = vector.load %arg9[%c24_208, %c0_209] : memref<64x32xf32, #tpu.memory_space<vmem>>, vector<8x32xf32>
    tpu.vector_store %arg9[%c24_208, %c0_209], %334 {strides = array<i32>} : memref<64x32xf32, #tpu.memory_space<vmem>>, vector<8x32xf32>,
    %c32_210 = arith.constant 32 : index
    %c0_211 = arith.constant 0 : index
    %338 = vector.load %arg12[%c32_210, %c0_211] : memref<64x128xf32, #tpu.memory_space<vmem>>, vector<8x128xf32>
    %c0_212 = arith.constant 0 : index
    %c0_213 = arith.constant 0 : index
    %339 = vector.load %arg13[%c0_212, %c0_213] : memref<8x32xf32, #tpu.memory_space<vmem>>, vector<8x32xf32>
    %340 = arith.truncf %339 : vector<8x32xf32> to vector<8x32xbf16>
    %cst_214 = arith.constant dense<0.000000e+00> : vector<8x128xf32>
    %341 = tpu.matmul %340, %224, %cst_214 {dimension_numbers = #tpu.dot_dimension_numbers<[1], [0], [0], [1], [0, 0, 1, 1], [], []>} : vector<8x32xbf16>, vector<32x128xbf16>, vector<8x128xf32> -> vector<8x128xf32>
    %342 = arith.addf %338, %341 : vector<8x128xf32>
    %343 = vector.extract_strided_slice %342 {offsets = [0, 0], sizes = [8, 96], strides = [1, 1]} : vector<8x128xf32> to vector<8x96xf32>
    %344 = arith.negf %343 : vector<8x96xf32>
    %345 = math.exp %344 : vector<8x96xf32>
    %cst_215 = arith.constant 1.000000e+00 : f32
    %346 = vector.broadcast %cst_215 : f32 to vector<8x96xf32>
    %347 = arith.addf %346, %345 : vector<8x96xf32>
    %348 = arith.divf %346, %347 : vector<8x96xf32>
    %349 = vector.extract_strided_slice %348 {offsets = [0, 0], sizes = [8, 32], strides = [1, 1]} : vector<8x96xf32> to vector<8x32xf32>
    %350 = vector.extract_strided_slice %348 {offsets = [0, 32], sizes = [8, 32], strides = [1, 1]} : vector<8x96xf32> to vector<8x32xf32>
    %351 = vector.extract_strided_slice %348 {offsets = [0, 64], sizes = [8, 32], strides = [1, 1]} : vector<8x96xf32> to vector<8x32xf32>
    %352 = vector.extract_strided_slice %342 {offsets = [0, 96], sizes = [8, 32], strides = [1, 1]} : vector<8x128xf32> to vector<8x32xf32>
    %353 = math.tanh %352 : vector<8x32xf32>
    %c0_216 = arith.constant 0 : index
    %c0_217 = arith.constant 0 : index
    %354 = vector.load %arg14[%c0_216, %c0_217] : memref<8x32xf32, #tpu.memory_space<vmem>>, vector<8x32xf32>
    %355 = arith.mulf %350, %354 : vector<8x32xf32>
    %356 = arith.mulf %349, %353 : vector<8x32xf32>
    %357 = arith.addf %355, %356 : vector<8x32xf32>
    %358 = math.tanh %357 : vector<8x32xf32>
    %359 = arith.mulf %351, %358 : vector<8x32xf32>
    %c0_218 = arith.constant 0 : index
    %c0_219 = arith.constant 0 : index
    %360 = vector.load %arg14[%c0_218, %c0_219] : memref<8x32xf32, #tpu.memory_space<vmem>>, vector<8x32xf32>
    tpu.vector_store %arg14[%c0_218, %c0_219], %357 {strides = array<i32>} : memref<8x32xf32, #tpu.memory_space<vmem>>, vector<8x32xf32>,
    %c0_220 = arith.constant 0 : index
    %c0_221 = arith.constant 0 : index
    %361 = vector.load %arg13[%c0_220, %c0_221] : memref<8x32xf32, #tpu.memory_space<vmem>>, vector<8x32xf32>
    tpu.vector_store %arg13[%c0_220, %c0_221], %359 {strides = array<i32>} : memref<8x32xf32, #tpu.memory_space<vmem>>, vector<8x32xf32>,
    %c32_222 = arith.constant 32 : index
    %c0_223 = arith.constant 0 : index
    %362 = vector.load %arg9[%c32_222, %c0_223] : memref<64x32xf32, #tpu.memory_space<vmem>>, vector<8x32xf32>
    tpu.vector_store %arg9[%c32_222, %c0_223], %359 {strides = array<i32>} : memref<64x32xf32, #tpu.memory_space<vmem>>, vector<8x32xf32>,
    %c40_224 = arith.constant 40 : index
    %c0_225 = arith.constant 0 : index
    %363 = vector.load %arg12[%c40_224, %c0_225] : memref<64x128xf32, #tpu.memory_space<vmem>>, vector<8x128xf32>
    %c0_226 = arith.constant 0 : index
    %c0_227 = arith.constant 0 : index
    %364 = vector.load %arg13[%c0_226, %c0_227] : memref<8x32xf32, #tpu.memory_space<vmem>>, vector<8x32xf32>
    %365 = arith.truncf %364 : vector<8x32xf32> to vector<8x32xbf16>
    %cst_228 = arith.constant dense<0.000000e+00> : vector<8x128xf32>
    %366 = tpu.matmul %365, %224, %cst_228 {dimension_numbers = #tpu.dot_dimension_numbers<[1], [0], [0], [1], [0, 0, 1, 1], [], []>} : vector<8x32xbf16>, vector<32x128xbf16>, vector<8x128xf32> -> vector<8x128xf32>
    %367 = arith.addf %363, %366 : vector<8x128xf32>
    %368 = vector.extract_strided_slice %367 {offsets = [0, 0], sizes = [8, 96], strides = [1, 1]} : vector<8x128xf32> to vector<8x96xf32>
    %369 = arith.negf %368 : vector<8x96xf32>
    %370 = math.exp %369 : vector<8x96xf32>
    %cst_229 = arith.constant 1.000000e+00 : f32
    %371 = vector.broadcast %cst_229 : f32 to vector<8x96xf32>
    %372 = arith.addf %371, %370 : vector<8x96xf32>
    %373 = arith.divf %371, %372 : vector<8x96xf32>
    %374 = vector.extract_strided_slice %373 {offsets = [0, 0], sizes = [8, 32], strides = [1, 1]} : vector<8x96xf32> to vector<8x32xf32>
    %375 = vector.extract_strided_slice %373 {offsets = [0, 32], sizes = [8, 32], strides = [1, 1]} : vector<8x96xf32> to vector<8x32xf32>
    %376 = vector.extract_strided_slice %373 {offsets = [0, 64], sizes = [8, 32], strides = [1, 1]} : vector<8x96xf32> to vector<8x32xf32>
    %377 = vector.extract_strided_slice %367 {offsets = [0, 96], sizes = [8, 32], strides = [1, 1]} : vector<8x128xf32> to vector<8x32xf32>
    %378 = math.tanh %377 : vector<8x32xf32>
    %c0_230 = arith.constant 0 : index
    %c0_231 = arith.constant 0 : index
    %379 = vector.load %arg14[%c0_230, %c0_231] : memref<8x32xf32, #tpu.memory_space<vmem>>, vector<8x32xf32>
    %380 = arith.mulf %375, %379 : vector<8x32xf32>
    %381 = arith.mulf %374, %378 : vector<8x32xf32>
    %382 = arith.addf %380, %381 : vector<8x32xf32>
    %383 = math.tanh %382 : vector<8x32xf32>
    %384 = arith.mulf %376, %383 : vector<8x32xf32>
    %c0_232 = arith.constant 0 : index
    %c0_233 = arith.constant 0 : index
    %385 = vector.load %arg14[%c0_232, %c0_233] : memref<8x32xf32, #tpu.memory_space<vmem>>, vector<8x32xf32>
    tpu.vector_store %arg14[%c0_232, %c0_233], %382 {strides = array<i32>} : memref<8x32xf32, #tpu.memory_space<vmem>>, vector<8x32xf32>,
    %c0_234 = arith.constant 0 : index
    %c0_235 = arith.constant 0 : index
    %386 = vector.load %arg13[%c0_234, %c0_235] : memref<8x32xf32, #tpu.memory_space<vmem>>, vector<8x32xf32>
    tpu.vector_store %arg13[%c0_234, %c0_235], %384 {strides = array<i32>} : memref<8x32xf32, #tpu.memory_space<vmem>>, vector<8x32xf32>,
    %c40_236 = arith.constant 40 : index
    %c0_237 = arith.constant 0 : index
    %387 = vector.load %arg9[%c40_236, %c0_237] : memref<64x32xf32, #tpu.memory_space<vmem>>, vector<8x32xf32>
    tpu.vector_store %arg9[%c40_236, %c0_237], %384 {strides = array<i32>} : memref<64x32xf32, #tpu.memory_space<vmem>>, vector<8x32xf32>,
    %c48_238 = arith.constant 48 : index
    %c0_239 = arith.constant 0 : index
    %388 = vector.load %arg12[%c48_238, %c0_239] : memref<64x128xf32, #tpu.memory_space<vmem>>, vector<8x128xf32>
    %c0_240 = arith.constant 0 : index
    %c0_241 = arith.constant 0 : index
    %389 = vector.load %arg13[%c0_240, %c0_241] : memref<8x32xf32, #tpu.memory_space<vmem>>, vector<8x32xf32>
    %390 = arith.truncf %389 : vector<8x32xf32> to vector<8x32xbf16>
    %cst_242 = arith.constant dense<0.000000e+00> : vector<8x128xf32>
    %391 = tpu.matmul %390, %224, %cst_242 {dimension_numbers = #tpu.dot_dimension_numbers<[1], [0], [0], [1], [0, 0, 1, 1], [], []>} : vector<8x32xbf16>, vector<32x128xbf16>, vector<8x128xf32> -> vector<8x128xf32>
    %392 = arith.addf %388, %391 : vector<8x128xf32>
    %393 = vector.extract_strided_slice %392 {offsets = [0, 0], sizes = [8, 96], strides = [1, 1]} : vector<8x128xf32> to vector<8x96xf32>
    %394 = arith.negf %393 : vector<8x96xf32>
    %395 = math.exp %394 : vector<8x96xf32>
    %cst_243 = arith.constant 1.000000e+00 : f32
    %396 = vector.broadcast %cst_243 : f32 to vector<8x96xf32>
    %397 = arith.addf %396, %395 : vector<8x96xf32>
    %398 = arith.divf %396, %397 : vector<8x96xf32>
    %399 = vector.extract_strided_slice %398 {offsets = [0, 0], sizes = [8, 32], strides = [1, 1]} : vector<8x96xf32> to vector<8x32xf32>
    %400 = vector.extract_strided_slice %398 {offsets = [0, 32], sizes = [8, 32], strides = [1, 1]} : vector<8x96xf32> to vector<8x32xf32>
    %401 = vector.extract_strided_slice %398 {offsets = [0, 64], sizes = [8, 32], strides = [1, 1]} : vector<8x96xf32> to vector<8x32xf32>
    %402 = vector.extract_strided_slice %392 {offsets = [0, 96], sizes = [8, 32], strides = [1, 1]} : vector<8x128xf32> to vector<8x32xf32>
    %403 = math.tanh %402 : vector<8x32xf32>
    %c0_244 = arith.constant 0 : index
    %c0_245 = arith.constant 0 : index
    %404 = vector.load %arg14[%c0_244, %c0_245] : memref<8x32xf32, #tpu.memory_space<vmem>>, vector<8x32xf32>
    %405 = arith.mulf %400, %404 : vector<8x32xf32>
    %406 = arith.mulf %399, %403 : vector<8x32xf32>
    %407 = arith.addf %405, %406 : vector<8x32xf32>
    %408 = math.tanh %407 : vector<8x32xf32>
    %409 = arith.mulf %401, %408 : vector<8x32xf32>
    %c0_246 = arith.constant 0 : index
    %c0_247 = arith.constant 0 : index
    %410 = vector.load %arg14[%c0_246, %c0_247] : memref<8x32xf32, #tpu.memory_space<vmem>>, vector<8x32xf32>
    tpu.vector_store %arg14[%c0_246, %c0_247], %407 {strides = array<i32>} : memref<8x32xf32, #tpu.memory_space<vmem>>, vector<8x32xf32>,
    %c0_248 = arith.constant 0 : index
    %c0_249 = arith.constant 0 : index
    %411 = vector.load %arg13[%c0_248, %c0_249] : memref<8x32xf32, #tpu.memory_space<vmem>>, vector<8x32xf32>
    tpu.vector_store %arg13[%c0_248, %c0_249], %409 {strides = array<i32>} : memref<8x32xf32, #tpu.memory_space<vmem>>, vector<8x32xf32>,
    %c48_250 = arith.constant 48 : index
    %c0_251 = arith.constant 0 : index
    %412 = vector.load %arg9[%c48_250, %c0_251] : memref<64x32xf32, #tpu.memory_space<vmem>>, vector<8x32xf32>
    tpu.vector_store %arg9[%c48_250, %c0_251], %409 {strides = array<i32>} : memref<64x32xf32, #tpu.memory_space<vmem>>, vector<8x32xf32>,
    %c56_252 = arith.constant 56 : index
    %c0_253 = arith.constant 0 : index
    %413 = vector.load %arg12[%c56_252, %c0_253] : memref<64x128xf32, #tpu.memory_space<vmem>>, vector<8x128xf32>
    %c0_254 = arith.constant 0 : index
    %c0_255 = arith.constant 0 : index
    %414 = vector.load %arg13[%c0_254, %c0_255] : memref<8x32xf32, #tpu.memory_space<vmem>>, vector<8x32xf32>
    %415 = arith.truncf %414 : vector<8x32xf32> to vector<8x32xbf16>
    %cst_256 = arith.constant dense<0.000000e+00> : vector<8x128xf32>
    %416 = tpu.matmul %415, %224, %cst_256 {dimension_numbers = #tpu.dot_dimension_numbers<[1], [0], [0], [1], [0, 0, 1, 1], [], []>} : vector<8x32xbf16>, vector<32x128xbf16>, vector<8x128xf32> -> vector<8x128xf32>
    %417 = arith.addf %413, %416 : vector<8x128xf32>
    %418 = vector.extract_strided_slice %417 {offsets = [0, 0], sizes = [8, 96], strides = [1, 1]} : vector<8x128xf32> to vector<8x96xf32>
    %419 = arith.negf %418 : vector<8x96xf32>
    %420 = math.exp %419 : vector<8x96xf32>
    %cst_257 = arith.constant 1.000000e+00 : f32
    %421 = vector.broadcast %cst_257 : f32 to vector<8x96xf32>
    %422 = arith.addf %421, %420 : vector<8x96xf32>
    %423 = arith.divf %421, %422 : vector<8x96xf32>
    %424 = vector.extract_strided_slice %423 {offsets = [0, 0], sizes = [8, 32], strides = [1, 1]} : vector<8x96xf32> to vector<8x32xf32>
    %425 = vector.extract_strided_slice %423 {offsets = [0, 32], sizes = [8, 32], strides = [1, 1]} : vector<8x96xf32> to vector<8x32xf32>
    %426 = vector.extract_strided_slice %423 {offsets = [0, 64], sizes = [8, 32], strides = [1, 1]} : vector<8x96xf32> to vector<8x32xf32>
    %427 = vector.extract_strided_slice %417 {offsets = [0, 96], sizes = [8, 32], strides = [1, 1]} : vector<8x128xf32> to vector<8x32xf32>
    %428 = math.tanh %427 : vector<8x32xf32>
    %c0_258 = arith.constant 0 : index
    %c0_259 = arith.constant 0 : index
    %429 = vector.load %arg14[%c0_258, %c0_259] : memref<8x32xf32, #tpu.memory_space<vmem>>, vector<8x32xf32>
    %430 = arith.mulf %425, %429 : vector<8x32xf32>
    %431 = arith.mulf %424, %428 : vector<8x32xf32>
    %432 = arith.addf %430, %431 : vector<8x32xf32>
    %433 = math.tanh %432 : vector<8x32xf32>
    %434 = arith.mulf %426, %433 : vector<8x32xf32>
    %c0_260 = arith.constant 0 : index
    %c0_261 = arith.constant 0 : index
    %435 = vector.load %arg14[%c0_260, %c0_261] : memref<8x32xf32, #tpu.memory_space<vmem>>, vector<8x32xf32>
    tpu.vector_store %arg14[%c0_260, %c0_261], %432 {strides = array<i32>} : memref<8x32xf32, #tpu.memory_space<vmem>>, vector<8x32xf32>,
    %c0_262 = arith.constant 0 : index
    %c0_263 = arith.constant 0 : index
    %436 = vector.load %arg13[%c0_262, %c0_263] : memref<8x32xf32, #tpu.memory_space<vmem>>, vector<8x32xf32>
    tpu.vector_store %arg13[%c0_262, %c0_263], %434 {strides = array<i32>} : memref<8x32xf32, #tpu.memory_space<vmem>>, vector<8x32xf32>,
    %c56_264 = arith.constant 56 : index
    %c0_265 = arith.constant 0 : index
    %437 = vector.load %arg9[%c56_264, %c0_265] : memref<64x32xf32, #tpu.memory_space<vmem>>, vector<8x32xf32>
    tpu.vector_store %arg9[%c56_264, %c0_265], %434 {strides = array<i32>} : memref<64x32xf32, #tpu.memory_space<vmem>>, vector<8x32xf32>,
    %c0_266 = arith.constant 0 : index
    %c0_267 = arith.constant 0 : index
    %438 = vector.load %arg13[%c0_266, %c0_267] : memref<8x32xf32, #tpu.memory_space<vmem>>, vector<8x32xf32>
    %c1_268 = arith.constant 1 : index
    %c0_269 = arith.constant 0 : index
    %c0_270 = arith.constant 0 : index
    %439 = vector.load %arg10[%c1_268, %c0_269, %c0_270] : memref<2x8x32xf32, #tpu.memory_space<vmem>>, vector<1x8x32xf32>
    %440 = vector.shape_cast %439 : vector<1x8x32xf32> to vector<8x32xf32>
    %441 = vector.shape_cast %438 : vector<8x32xf32> to vector<1x8x32xf32>
    tpu.vector_store %arg10[%c1_268, %c0_269, %c0_270], %441 {strides = array<i32>} : memref<2x8x32xf32, #tpu.memory_space<vmem>>, vector<1x8x32xf32>,
    %c0_271 = arith.constant 0 : index
    %c0_272 = arith.constant 0 : index
    %442 = vector.load %arg14[%c0_271, %c0_272] : memref<8x32xf32, #tpu.memory_space<vmem>>, vector<8x32xf32>
    %c1_273 = arith.constant 1 : index
    %c0_274 = arith.constant 0 : index
    %c0_275 = arith.constant 0 : index
    %443 = vector.load %arg11[%c1_273, %c0_274, %c0_275] : memref<2x8x32xf32, #tpu.memory_space<vmem>>, vector<1x8x32xf32>
    %444 = vector.shape_cast %443 : vector<1x8x32xf32> to vector<8x32xf32>
    %445 = vector.shape_cast %442 : vector<8x32xf32> to vector<1x8x32xf32>
    tpu.vector_store %arg11[%c1_273, %c0_274, %c0_275], %445 {strides = array<i32>} : memref<2x8x32xf32, #tpu.memory_space<vmem>>, vector<1x8x32xf32>,
    return
  }
}

</mosaic_0001>

<bundles_post_ra>
// kernel: tpu_custom_call.1
= control target key start
LH: loop header
LB: loop body
LE: loop exit
PB: predicated region body
PF: predicated region fallthrough
CT: control target
= control target key end

     0   :  { %17 = vsyncpa [#allocation6], 0  ;;  %vm80_vm0 = vcmask 1041408   ;;  %v2200_v4 = vmov 0.0   ;;  %vm67_vm1 = vcmask 31744   ;;  %vm45_vm2 = vcmask 261120   ;;  %s2770_s0 = inlined_call_operand.vmem [shape: f32[64,4], index: 0, kind: input, shape index: {}]   ;;  %s2771_s1 = inlined_call_operand.vmem [shape: f32[2,8,32], index: 1, kind: input, shape index: {}]   ;;  %s2772_s2 = inlined_call_operand.vmem [shape: f32[2,8,32], index: 2, kind: input, shape index: {}]   ;;  %s2773_s3 = inlined_call_operand.vmem [shape: bf16[4,128], index: 3, kind: input, shape index: {}]   ;;  %s2774_s4 = inlined_call_operand.vmem [shape: bf16[32,128], index: 4, kind: input, shape index: {}]   ;;  %s2775_s5 = inlined_call_operand.vmem [shape: f32[1,128], index: 5, kind: input, shape index: {}]   ;;  %s2776_s6 = inlined_call_operand.vmem [shape: bf16[32,128], index: 6, kind: input, shape index: {}]   ;;  %s2777_s7 = inlined_call_operand.vmem [shape: bf16[32,128], index: 7, kind: input, shape index: {}]   ;;  %s2778_s8 = inlined_call_operand.vmem [shape: f32[1,128], index: 8, kind: input, shape index: {}]   ;;  %s2779_s9 = inlined_call_operand.vmem [shape: f32[64,32], index: 9, kind: output, shape index: {0}]   ;;  %s2780_s10 = inlined_call_operand.hbm [shape: f32[2,8,32], index: 10, kind: output, shape index: {1}]   ;;  %s2781_s11 = inlined_call_operand.hbm [shape: f32[2,8,32], index: 11, kind: output, shape index: {2}]  }
   0x1   :  { %v38_v0 = vld [vmem:[%s2773_s3] sm:$0x3]  ;;  %v50_v2 = vld [vmem:[%s2770_s0 + $0x8] sm:$0xff]  ;;  %1868 = vmatprep.subr.bf16.mxu1 %v2200_v4  ;;  %v51_v7 = vld [vmem:[%s2770_s0 + $0x10] sm:$0xff]  ;;  %vm2201_vm3 = vmmov 0  }
   0x2   :  { %v49_v1 = vld [vmem:[%s2770_s0] sm:$0xff]  ;;  %2008 = vmatprep.subr.msk.bf16.mxu0 %vm80_vm0, %v38_v0  ;;  %v82_v3 = vsel %vm80_vm0, %v38_v0, 0  ;;  %v52_v8 = vld [vmem:[%s2770_s0 + $0x18] sm:$0xff]  ;;  %v2294_v10 = vld [vmem:[%s2774_s4 + $0x8] sm:$0xff]   ;;  %1872 = vmatprep.mubr.msk.bf16.mxu1 %vm2201_vm3, %v2200_v4 }
   0x3   :  { %v57_v5 = vpack.c.bf16 %v50_v2, %v49_v1  ;;  %1859 = vmatpush3.bf16.msra.mxu0 %v82_v3  ;;  %v2282_v6 = vld [vmem:[%s2774_s4] sm:$0xff]   ;;  %v58_v9 = vpack.c.bf16 %v52_v8, %v51_v7 }
   0x4   :  { %1869 = vmatpush3.bf16.msra.mxu1 %v2282_v6  ;;  %v44_v11 = vld [vmem:[%s2771_s1] sm:$0xff]  ;;  %1884 = vmatprep.subr.bf16.mxu0 %v2200_v4 }
   0x5   :  { %1860 = vmatprep.mubr.msk.bf16.mxu0 %vm67_vm1, %v57_v5  ;;  %1870 = vmatprep.subr.bf16.mxu1 %v2200_v4  ;;  %46 = vst.msk [vmem:[#allocation3] sm:$0xff] %vm45_vm2, %v44_v11 }
   0x6   :  { %1861 = vmatmul.mubr.msk.bf16.vlgmr.msra.gmra.mrb[0].mxu0 %vm67_vm1, %v58_v9 }
   0x7   :  { %1885 = vmatpush3.bf16.msra.mxu0 %v2282_v6 }
   0x8   :  { %1886 = vmatprep.subr.bf16.mxu0 %v2200_v4 }
   0x9   :  { %18 = vsyncpa [#allocation8], 0  ;;  %1871 = vmatpush3.bf16.msra.mxu1 %v2294_v10  ;;  %v47_v14 = vld [vmem:[%s2772_s2] sm:$0xff]  ;;  %s2202_s16 = smov 32   ;;  %s2204_s17 = smov 64   ;;  %v54_v1 = vld [vmem:[%s2770_s0 + $0x28] sm:$0xff] }
   0xa   :  { %1876 = vmatprep.subr.bf16.mxu1 %v2200_v4  ;;  %48 = vst.msk [vmem:[#allocation4] sm:$0xff] %vm45_vm2, %v47_v14  ;;  %v2330_v19 = vld [vmem:[%s2775_s5] ss:$0 sm:$0xff]  ;;  %s2203_s5 = smov 96   ;;  %v55_v2 = vld [vmem:[%s2770_s0 + $0x30] sm:$0xff]  ;;  %v56_v5 = vld [vmem:[%s2770_s0 + $0x38] sm:$0xff] }
   0xb   :  { %1887 = vmatpush3.bf16.msra.mxu0 %v2294_v10  ;;  %v53_v0 = vld [vmem:[%s2770_s0 + $0x20] sm:$0xff]  ;;  %v60_v7 = vpack.c.bf16 %v56_v5, %v55_v2  ;;  %s2205_s19 = smov [#allocation7]  }
   0xc   :  { %1900 = vmatprep.subr.bf16.mxu0 %v2200_v4  ;;  %v158_v12 = vld [vmem:[#allocation3] sm:$0xff]  ;;  %v59_v3 = vpack.c.bf16 %v54_v1, %v53_v0  ;;  %s1732_s20 = sshll.u32 %s2205_s19, 4  ;;  %s1733_s20 = int_to_ptr.vmem [resolvable:$true] %s1732_s20 }
   0xd   :  { %v159_v13 = vpack.c.bf16 %v158_v12, %v158_v12  ;;  %s2152_s21 = scalar_lea.vmem %s1733_s20, 256  ;;  %p2157_p1 = scmp.lt.s32.totalorder %s1733_s20, %s1733_s20 }
   0xe   :  { %1864 = vmatprep.mubr.msk.bf16.mxu0 %vm67_vm1, %v59_v3  ;;  %p2153_p0 = scmp.ne.s32.totalorder %s1733_s20, %s2152_s21  ;;  %p2158_p2 = scmp.lt.s32.totalorder %s2152_s21, %s2152_s21 }
   0xf   :  { %1873 = vmatmul.mubr.msk.bf16.vlgmr.msra.gmra.mrb[0].mxu1 %vm45_vm2, %v159_v13  ;;  %1865 = vmatmul.mubr.msk.bf16.gmra.mrb[4].mxu0 %vm67_vm1, %v60_v7 }
  0x10   :  { %1877 = vmatpush3.bf16.msra.mxu1 %v2282_v6  ;;  %1880 = vmatprep.mubr.msk.bf16.mxu1 %vm2201_vm3, %v2200_v4  ;;  %p2159_p3 = por %p2158_p2, %p2157_p1 }
  0x11   :  { %1878 = vmatprep.subr.bf16.mxu1 %v2200_v4  ;;  %v223_v27 = vld [vmem:[#allocation4] sm:$0xff]  ;;  %1888 = vmatprep.mubr.msk.bf16.mxu0 %vm2201_vm3, %v2200_v4 }
  0x12   :  { %p2160_p4 = pnand %p2159_p3, %p2153_p0 }
  0x14   :  { %1879 = vmatpush3.bf16.msra.mxu1 %v2294_v10 }
  0x15   :  { %1892 = vmatprep.subr.bf16.mxu1 %v2200_v4 }
  0xd9   :  { %v2323_v15 = vpop.f32.mrb[0].mxu0 }
  0xda   :  { %v118_v16 = vpop.f32.mrb[1].mxu0 }
  0xdb   :  { %v2325_v17 = vpop.f32.mrb[2].mxu0  ;;  %v119_v20 = vadd.f32 %v2330_v19, %v118_v16 }
  0xdc   :  { %v121_v18 = vpop.f32.mrb[3].mxu0 }
  0xdd   :  { %v122_v46 = vadd.f32 %v2330_v19, %v121_v18 }
  0xe2   :  { %v209_v21 = vpop.f32.mrb[0].mxu1  ;;  %v2377_v13 = vpop.f32.mrb[4].mxu0 }
  0xe3   :  { %v215_v22 = vadd.f32 %v209_v21, %v119_v20  ;;  %v1874_v23 = vpop.f32.mrb[1].mxu1  ;;  %v2379_v14 = vpop.f32.mrb[5].mxu0 }
  0xe4   :  { %v212_v24 = vpop.f32.mrb[2].mxu1  ;;  %v2381_v16 = vpop.f32.mrb[6].mxu0  ;;  %v127_v23 = vadd.f32 %v2323_v15, %v2330_v19 }
  0xe5   :  { %2024 = vtanh.f32 %v215_v22  ;;  %v1875_v25 = vpop.f32.mrb[3].mxu1  ;;  %v1757_v28 = vmul.f32 -1.442695, %v215_v22  ;;  %v2383_v18 = vpop.f32.mrb[7].mxu0 }
  0xe7   :  { %2026 = vpow2.f32 %v1757_v28 }
  0xef   :  { %v2025_v26 = vpop.eup %2024 }
  0xf0   :  { %230 = vrot.lane.b32.xlu0 %v2025_v26, %s2202_s16 }
  0xf1   :  { %v2027_v29 = vpop.eup %2026 }
  0xf2   :  { %v219_v30 = vadd.f32 1.0, %v2027_v29 }
  0xf4   :  { %225 = vrot.lane.b32.xlu0 %v223_v27, %s2202_s16  ;;  %2028 = vrcp.f32 %v219_v30 }
  0xfe   :  { %v2029_v31 = vpop.eup %2028 }
 0x162   :  { %v231_v32 = vpop.permute.xlu0 %230 }
 0x163   :  { %v233_v33 = vmul.f32 %v2029_v31, %v231_v32 }
 0x165   :  { %235 = vrot.lane.b32.xlu1 %v233_v33, %s2202_s16 }
 0x166   :  { %v226_v34 = vpop.permute.xlu0 %225 }
 0x167   :  { %v228_v35 = vmul.f32 %v2029_v31, %v226_v34 }
 0x1d7   :  { %v236_v36 = vpop.permute.xlu1 %235 }
 0x1d8   :  { %v238_v37 = vadd.f32 %v236_v36, %v228_v35 }
 0x1da   :  { %2030 = vtanh.f32 %v238_v37 }
 0x1e4   :  { %v2031_v38 = vpop.eup %2030 }
 0x1e5   :  { %241 = vrot.lane.b32.xlu1 %v2031_v38, %s2202_s16 }
 0x1e9   :  { %246 = vrot.lane.b32.xlu1 %v238_v37, %s2203_s5 }
 0x257   :  { %v242_v39 = vpop.permute.xlu1 %241 }
 0x258   :  { %v244_v40 = vmul.f32 %v2029_v31, %v242_v39 }
 0x25a   :  { %251 = vrot.lane.b32.xlu0 %v244_v40, %s2204_s17 }
 0x25b   :  { %v247_v41 = vpop.permute.xlu1 %246 }
 0x25c   :  { %249 = vst.msk [vmem:[#allocation4] sm:$0xff] %vm45_vm2, %v247_v41 }
 0x263   :  { %v310_v42 = vld [vmem:[#allocation4] sm:$0xff] }
 0x264   :  { %312 = vrot.lane.b32.xlu1 %v310_v42, %s2202_s16 }
 0x2cc   :  { %v252_v43 = vpop.permute.xlu0 %251 }
 0x2cd   :  { %254 = vst.msk [vmem:[#allocation3] sm:$0xff] %vm45_vm2, %v252_v43  ;;  %255 = vst.msk [vmem:[%s2779_s9] sm:$0xff] %vm45_vm2, %v252_v43 }
 0x2d4   :  { %v257_v44 = vld [vmem:[#allocation3] sm:$0xff] }
 0x2d5   :  { %v258_v45 = vpack.c.bf16 %v257_v44, %v257_v44 }
 0x2d6   :  { %v313_v59 = vpop.permute.xlu1 %312 }
 0x2d7   :  { %1881 = vmatmul.mubr.msk.bf16.vlgmr.msra.gmra.mrb[4].mxu1 %vm45_vm2, %v258_v45 }
 0x2d8   :  { %1893 = vmatpush3.bf16.msra.mxu1 %v2282_v6  ;;  %1896 = vmatprep.mubr.msk.bf16.mxu1 %vm2201_vm3, %v2200_v4 }
 0x2d9   :  { %1894 = vmatprep.subr.bf16.mxu1 %v2200_v4 }
 0x2dc   :  { %1895 = vmatpush3.bf16.msra.mxu1 %v2294_v10 }
 0x2dd   :  { %1908 = vmatprep.subr.bf16.mxu1 %v2200_v4 }
 0x3aa   :  { %v296_v47 = vpop.f32.mrb[4].mxu1 }
 0x3ab   :  { %v302_v48 = vadd.f32 %v296_v47, %v122_v46  ;;  %v1882_v49 = vpop.f32.mrb[5].mxu1  ;;  %v130_v47 = vadd.f32 %v2325_v17, %v2330_v19 }
 0x3ac   :  { %v299_v50 = vpop.f32.mrb[6].mxu1 }
 0x3ad   :  { %2032 = vtanh.f32 %v302_v48  ;;  %v1883_v51 = vpop.f32.mrb[7].mxu1  ;;  %v1759_v53 = vmul.f32 -1.442695, %v302_v48 }
 0x3af   :  { %2034 = vpow2.f32 %v1759_v53 }
 0x3b7   :  { %v2033_v52 = vpop.eup %2032 }
 0x3b8   :  { %317 = vrot.lane.b32.xlu0 %v2033_v52, %s2202_s16 }
 0x3b9   :  { %v2035_v54 = vpop.eup %2034 }
 0x3ba   :  { %v306_v55 = vadd.f32 1.0, %v2035_v54 }
 0x3bc   :  { %2036 = vrcp.f32 %v306_v55 }
 0x3c6   :  { %v2037_v56 = vpop.eup %2036 }
 0x3c7   :  { %v315_v60 = vmul.f32 %v2037_v56, %v313_v59 }
 0x42a   :  { %v318_v57 = vpop.permute.xlu0 %317 }
 0x42b   :  { %v320_v58 = vmul.f32 %v2037_v56, %v318_v57 }
 0x42d   :  { %322 = vrot.lane.b32.xlu0 %v320_v58, %s2202_s16 }
 0x49f   :  { %v323_v61 = vpop.permute.xlu0 %322 }
 0x4a0   :  { %v325_v62 = vadd.f32 %v323_v61, %v315_v60 }
 0x4a2   :  { %2038 = vtanh.f32 %v325_v62 }
 0x4ac   :  { %v2039_v63 = vpop.eup %2038 }
 0x4ad   :  { %328 = vrot.lane.b32.xlu1 %v2039_v63, %s2202_s16 }
 0x4b1   :  { %333 = vrot.lane.b32.xlu1 %v325_v62, %s2203_s5 }
 0x51f   :  { %v329_v8 = vpop.permute.xlu1 %328 }
 0x520   :  { %v331_v9 = vmul.f32 %v2037_v56, %v329_v8 }
 0x522   :  { %338 = vrot.lane.b32.xlu0 %v331_v9, %s2204_s17  ;;  %v135_v9 = vadd.f32 %v2330_v19, %v2379_v14 }
 0x523   :  { %v334_v11 = vpop.permute.xlu1 %333 }
 0x524   :  { %336 = vst.msk [vmem:[#allocation4] sm:$0xff] %vm45_vm2, %v334_v11 }
 0x52b   :  { %v397_v12 = vld [vmem:[#allocation4] sm:$0xff] }
 0x52c   :  { %399 = vrot.lane.b32.xlu1 %v397_v12, %s2202_s16 }
 0x594   :  { %v339_v20 = vpop.permute.xlu0 %338 }
 0x595   :  { %341 = vst.msk [vmem:[#allocation3] sm:$0xff] %vm45_vm2, %v339_v20  ;;  %342 = vst.msk [vmem:[%s2779_s9 + $0x8] sm:$0xff] %vm45_vm2, %v339_v20 }
 0x59c   :  { %v344_v21 = vld [vmem:[#allocation3] sm:$0xff] }
 0x59d   :  { %v345_v22 = vpack.c.bf16 %v344_v21, %v344_v21 }
 0x59e   :  { %v400_v15 = vpop.permute.xlu1 %399 }
 0x59f   :  { %1889 = vmatmul.mubr.msk.bf16.vlgmr.msra.gmra.mrb[8].mxu0 %vm45_vm2, %v345_v22 }
 0x5a0   :  { %1901 = vmatpush3.bf16.msra.mxu0 %v2282_v6  ;;  %1904 = vmatprep.mubr.msk.bf16.mxu0 %vm2201_vm3, %v2200_v4 }
 0x5a1   :  { %1902 = vmatprep.subr.bf16.mxu0 %v2200_v4 }
 0x5a4   :  { %1903 = vmatpush3.bf16.msra.mxu0 %v2294_v10 }
 0x5a5   :  { %1916 = vmatprep.subr.bf16.mxu0 %v2200_v4 }
 0x672   :  { %v383_v24 = vpop.f32.mrb[8].mxu0 }
 0x673   :  { %v389_v25 = vadd.f32 %v383_v24, %v127_v23  ;;  %v1890_v26 = vpop.f32.mrb[9].mxu0 }
 0x674   :  { %v386_v27 = vpop.f32.mrb[10].mxu0 }
 0x675   :  { %2040 = vtanh.f32 %v389_v25  ;;  %v1891_v28 = vpop.f32.mrb[11].mxu0  ;;  %v1761_v30 = vmul.f32 -1.442695, %v389_v25 }
 0x677   :  { %2042 = vpow2.f32 %v1761_v30 }
 0x67f   :  { %v2041_v29 = vpop.eup %2040 }
 0x680   :  { %404 = vrot.lane.b32.xlu0 %v2041_v29, %s2202_s16 }
 0x681   :  { %v2043_v31 = vpop.eup %2042 }
 0x682   :  { %v393_v32 = vadd.f32 1.0, %v2043_v31 }
 0x684   :  { %2044 = vrcp.f32 %v393_v32 }
 0x68e   :  { %v2045_v33 = vpop.eup %2044 }
 0x68f   :  { %v402_v36 = vmul.f32 %v2045_v33, %v400_v15 }
 0x6f2   :  { %v405_v34 = vpop.permute.xlu0 %404 }
 0x6f3   :  { %v407_v35 = vmul.f32 %v2045_v33, %v405_v34 }
 0x6f5   :  { %409 = vrot.lane.b32.xlu0 %v407_v35, %s2202_s16 }
 0x767   :  { %v410_v37 = vpop.permute.xlu0 %409 }
 0x768   :  { %v412_v38 = vadd.f32 %v410_v37, %v402_v36 }
 0x76a   :  { %2046 = vtanh.f32 %v412_v38 }
 0x774   :  { %v2047_v39 = vpop.eup %2046 }
 0x775   :  { %415 = vrot.lane.b32.xlu1 %v2047_v39, %s2202_s16 }
 0x779   :  { %420 = vrot.lane.b32.xlu1 %v412_v38, %s2203_s5 }
 0x7e7   :  { %v416_v40 = vpop.permute.xlu1 %415 }
 0x7e8   :  { %v418_v41 = vmul.f32 %v2045_v33, %v416_v40  ;;  %v138_v40 = vadd.f32 %v2330_v19, %v2383_v18 }
 0x7ea   :  { %425 = vrot.lane.b32.xlu0 %v418_v41, %s2204_s17 }
 0x7eb   :  { %v421_v42 = vpop.permute.xlu1 %420 }
 0x7ec   :  { %423 = vst.msk [vmem:[#allocation4] sm:$0xff] %vm45_vm2, %v421_v42 }
 0x7f3   :  { %v484_v43 = vld [vmem:[#allocation4] sm:$0xff] }
 0x7f4   :  { %486 = vrot.lane.b32.xlu1 %v484_v43, %s2202_s16 }
 0x85c   :  { %v426_v44 = vpop.permute.xlu0 %425 }
 0x85d   :  { %428 = vst.msk [vmem:[#allocation3] sm:$0xff] %vm45_vm2, %v426_v44  ;;  %429 = vst.msk [vmem:[%s2779_s9 + $0x10] sm:$0xff] %vm45_vm2, %v426_v44 }
 0x864   :  { %v431_v45 = vld [vmem:[#allocation3] sm:$0xff] }
 0x865   :  { %v432_v46 = vpack.c.bf16 %v431_v45, %v431_v45 }
 0x866   :  { %v487_v17 = vpop.permute.xlu1 %486 }
 0x867   :  { %1897 = vmatmul.mubr.msk.bf16.vlgmr.msra.gmra.mrb[8].mxu1 %vm45_vm2, %v432_v46 }
 0x868   :  { %1909 = vmatpush3.bf16.msra.mxu1 %v2282_v6  ;;  %1912 = vmatprep.mubr.msk.bf16.mxu1 %vm2201_vm3, %v2200_v4 }
 0x869   :  { %1910 = vmatprep.subr.bf16.mxu1 %v2200_v4 }
 0x86c   :  { %1911 = vmatpush3.bf16.msra.mxu1 %v2294_v10 }
 0x86d   :  { %1924 = vmatprep.subr.bf16.mxu1 %v2200_v4 }
 0x93a   :  { %v470_v48 = vpop.f32.mrb[8].mxu1 }
 0x93b   :  { %v476_v49 = vadd.f32 %v470_v48, %v130_v47  ;;  %v1898_v50 = vpop.f32.mrb[9].mxu1 }
 0x93c   :  { %v473_v51 = vpop.f32.mrb[10].mxu1 }
 0x93d   :  { %2048 = vtanh.f32 %v476_v49  ;;  %v1899_v52 = vpop.f32.mrb[11].mxu1  ;;  %v1763_v54 = vmul.f32 -1.442695, %v476_v49 }
 0x93f   :  { %2050 = vpow2.f32 %v1763_v54 }
 0x947   :  { %v2049_v53 = vpop.eup %2048 }
 0x948   :  { %491 = vrot.lane.b32.xlu0 %v2049_v53, %s2202_s16 }
 0x949   :  { %v2051_v55 = vpop.eup %2050 }
 0x94a   :  { %v480_v56 = vadd.f32 1.0, %v2051_v55  ;;  %v2020_v55 = vld [vmem:[%s2776_s6] sm:$0xff]  }
 0x94c   :  { %2052 = vrcp.f32 %v480_v56 }
 0x956   :  { %v2053_v57 = vpop.eup %2052 }
 0x957   :  { %v489_v60 = vmul.f32 %v2053_v57, %v487_v17 }
 0x9ba   :  { %v492_v58 = vpop.permute.xlu0 %491 }
 0x9bb   :  { %v494_v59 = vmul.f32 %v2053_v57, %v492_v58 }
 0x9bd   :  { %496 = vrot.lane.b32.xlu0 %v494_v59, %s2202_s16 }
 0xa2f   :  { %v497_v61 = vpop.permute.xlu0 %496 }
 0xa30   :  { %v499_v62 = vadd.f32 %v497_v61, %v489_v60  ;;  %v885_v60 = vld [vmem:[%s2779_s9 + $0x8] sm:$0xff] }
 0xa32   :  { %2054 = vtanh.f32 %v499_v62 }
 0xa3c   :  { %v2055_v63 = vpop.eup %2054 }
 0xa3d   :  { %502 = vrot.lane.b32.xlu1 %v2055_v63, %s2202_s16  ;;  %v884_v63 = vld [vmem:[%s2779_s9] sm:$0xff] }
 0xa41   :  { %507 = vrot.lane.b32.xlu1 %v499_v62, %s2203_s5 }
 0xaaf   :  { %v503_v0 = vpop.permute.xlu1 %502 }
 0xab0   :  { %v505_v1 = vmul.f32 %v2053_v57, %v503_v0  ;;  %v2021_v0 = vld [vmem:[%s2776_s6 + $0x8] sm:$0xff]  }
 0xab2   :  { %512 = vrot.lane.b32.xlu0 %v505_v1, %s2204_s17  ;;  %v892_v1 = vpack.c.bf16 %v885_v60, %v884_v63 }
 0xab3   :  { %v508_v2 = vpop.permute.xlu1 %507 }
 0xab4   :  { %510 = vst.msk [vmem:[#allocation4] sm:$0xff] %vm45_vm2, %v508_v2 }
 0xabb   :  { %v571_v3 = vld [vmem:[#allocation4] sm:$0xff] }
 0xabc   :  { %573 = vrot.lane.b32.xlu1 %v571_v3, %s2202_s16 }
 0xb24   :  { %v513_v5 = vpop.permute.xlu0 %512 }
 0xb25   :  { %515 = vst.msk [vmem:[#allocation3] sm:$0xff] %vm45_vm2, %v513_v5  ;;  %516 = vst.msk [vmem:[%s2779_s9 + $0x18] sm:$0xff] %vm45_vm2, %v513_v5  ;;  %v886_v5 = vld [vmem:[%s2779_s9 + $0x10] sm:$0xff] }
 0xb2c   :  { %v518_v7 = vld [vmem:[#allocation3] sm:$0xff]  ;;  %v887_v2 = vld [vmem:[%s2779_s9 + $0x18] sm:$0xff] }
 0xb2d   :  { %v519_v8 = vpack.c.bf16 %v518_v7, %v518_v7  ;;  %v893_v7 = vpack.c.bf16 %v887_v2, %v886_v5 }
 0xb2e   :  { %v574_v14 = vpop.permute.xlu1 %573 }
 0xb2f   :  { %1905 = vmatmul.mubr.msk.bf16.vlgmr.msra.gmra.mrb[12].mxu0 %vm45_vm2, %v519_v8 }
 0xb30   :  { %1917 = vmatpush3.bf16.msra.mxu0 %v2282_v6  ;;  %1920 = vmatprep.mubr.msk.bf16.mxu0 %vm2201_vm3, %v2200_v4 }
 0xb31   :  { %1918 = vmatprep.subr.bf16.mxu0 %v2200_v4 }
 0xb34   :  { %1919 = vmatpush3.bf16.msra.mxu0 %v2294_v10 }
 0xb35   :  { %1932 = vmatprep.subr.bf16.mxu0 %v2020_v55 }
 0xc02   :  { %v557_v11 = vpop.f32.mrb[12].mxu0 }
 0xc03   :  { %v563_v12 = vadd.f32 %v557_v11, %v135_v9  ;;  %v1906_v20 = vpop.f32.mrb[13].mxu0  ;;  %v143_v11 = vadd.f32 %v2377_v13, %v2330_v19 }
 0xc04   :  { %v560_v21 = vpop.f32.mrb[14].mxu0 }
 0xc05   :  { %2056 = vtanh.f32 %v563_v12  ;;  %v1907_v22 = vpop.f32.mrb[15].mxu0  ;;  %v1765_v24 = vmul.f32 -1.442695, %v563_v12 }
 0xc07   :  { %2058 = vpow2.f32 %v1765_v24 }
 0xc0f   :  { %v2057_v23 = vpop.eup %2056 }
 0xc10   :  { %578 = vrot.lane.b32.xlu0 %v2057_v23, %s2202_s16 }
 0xc11   :  { %v2059_v25 = vpop.eup %2058 }
 0xc12   :  { %v567_v26 = vadd.f32 1.0, %v2059_v25 }
 0xc14   :  { %2060 = vrcp.f32 %v567_v26 }
 0xc1e   :  { %v2061_v27 = vpop.eup %2060 }
 0xc1f   :  { %v576_v30 = vmul.f32 %v2061_v27, %v574_v14 }
 0xc82   :  { %v579_v28 = vpop.permute.xlu0 %578 }
 0xc83   :  { %v581_v29 = vmul.f32 %v2061_v27, %v579_v28 }
 0xc85   :  { %583 = vrot.lane.b32.xlu0 %v581_v29, %s2202_s16 }
 0xcf7   :  { %v584_v31 = vpop.permute.xlu0 %583 }
 0xcf8   :  { %v586_v32 = vadd.f32 %v584_v31, %v576_v30 }
 0xcfa   :  { %2062 = vtanh.f32 %v586_v32 }
 0xd04   :  { %v2063_v33 = vpop.eup %2062 }
 0xd05   :  { %589 = vrot.lane.b32.xlu1 %v2063_v33, %s2202_s16 }
 0xd09   :  { %594 = vrot.lane.b32.xlu1 %v586_v32, %s2203_s5 }
 0xd77   :  { %v590_v34 = vpop.permute.xlu1 %589 }
 0xd78   :  { %v592_v35 = vmul.f32 %v2061_v27, %v590_v34 }
 0xd7a   :  { %599 = vrot.lane.b32.xlu0 %v592_v35, %s2204_s17 }
 0xd7b   :  { %v595_v15 = vpop.permute.xlu1 %594 }
 0xd7c   :  { %597 = vst.msk [vmem:[#allocation4] sm:$0xff] %vm45_vm2, %v595_v15 }
 0xd83   :  { %v658_v36 = vld [vmem:[#allocation4] sm:$0xff] }
 0xd84   :  { %660 = vrot.lane.b32.xlu1 %v658_v36, %s2202_s16 }
 0xdec   :  { %v600_v37 = vpop.permute.xlu0 %599 }
 0xded   :  { %602 = vst.msk [vmem:[#allocation3] sm:$0xff] %vm45_vm2, %v600_v37  ;;  %603 = vst.msk [vmem:[%s2779_s9 + $0x20] sm:$0xff] %vm45_vm2, %v600_v37 }
 0xdf4   :  { %v605_v38 = vld [vmem:[#allocation3] sm:$0xff]  ;;  %v888_v8 = vld [vmem:[%s2779_s9 + $0x20] sm:$0xff] }
 0xdf5   :  { %v606_v39 = vpack.c.bf16 %v605_v38, %v605_v38 }
 0xdf6   :  { %v661_v18 = vpop.permute.xlu1 %660 }
 0xdf7   :  { %1913 = vmatmul.mubr.msk.bf16.vlgmr.msra.gmra.mrb[12].mxu1 %vm45_vm2, %v606_v39 }
 0xdf8   :  { %1925 = vmatpush3.bf16.msra.mxu1 %v2282_v6  ;;  %1928 = vmatprep.mubr.msk.bf16.mxu1 %vm2201_vm3, %v2200_v4 }
 0xdf9   :  { %1926 = vmatprep.subr.bf16.mxu1 %v2200_v4 }
 0xdfc   :  { %1927 = vmatpush3.bf16.msra.mxu1 %v2294_v10 }
 0xdfd   :  { %1944 = vmatprep.subr.bf16.mxu1 %v2200_v4 }
 0xeca   :  { %v644_v41 = vpop.f32.mrb[12].mxu1 }
 0xecb   :  { %v650_v42 = vadd.f32 %v644_v41, %v138_v40  ;;  %v1914_v43 = vpop.f32.mrb[13].mxu1 }
 0xecc   :  { %v647_v44 = vpop.f32.mrb[14].mxu1 }
 0xecd   :  { %2064 = vtanh.f32 %v650_v42  ;;  %v1915_v45 = vpop.f32.mrb[15].mxu1  ;;  %v1767_v6 = vmul.f32 -1.442695, %v650_v42  ;;  %v146_v44 = vadd.f32 %v2381_v16, %v2330_v19 }
 0xecf   :  { %2066 = vpow2.f32 %v1767_v6 }
 0xed7   :  { %v2065_v46 = vpop.eup %2064 }
 0xed8   :  { %665 = vrot.lane.b32.xlu0 %v2065_v46, %s2202_s16 }
 0xed9   :  { %v2067_v47 = vpop.eup %2066 }
 0xeda   :  { %v654_v48 = vadd.f32 1.0, %v2067_v47 }
 0xedc   :  { %2068 = vrcp.f32 %v654_v48 }
 0xee6   :  { %v2069_v10 = vpop.eup %2068 }
 0xee7   :  { %v663_v51 = vmul.f32 %v2069_v10, %v661_v18 }
 0xf4a   :  { %v666_v49 = vpop.permute.xlu0 %665 }
 0xf4b   :  { %v668_v50 = vmul.f32 %v2069_v10, %v666_v49 }
 0xf4d   :  { %670 = vrot.lane.b32.xlu0 %v668_v50, %s2202_s16 }
 0xfbf   :  { %v671_v52 = vpop.permute.xlu0 %670 }
 0xfc0   :  { %v673_v53 = vadd.f32 %v671_v52, %v663_v51 }
 0xfc2   :  { %2070 = vtanh.f32 %v673_v53 }
 0xfcc   :  { %v2071_v54 = vpop.eup %2070 }
 0xfcd   :  { %676 = vrot.lane.b32.xlu1 %v2071_v54, %s2202_s16 }
 0xfd1   :  { %681 = vrot.lane.b32.xlu1 %v673_v53, %s2203_s5 }
0x103f   :  { %v677_v56 = vpop.permute.xlu1 %676 }
0x1040   :  { %v679_v57 = vmul.f32 %v2069_v10, %v677_v56 }
0x1042   :  { %686 = vrot.lane.b32.xlu0 %v679_v57, %s2204_s17  ;;  %v2536_v57 = vld [vmem:[%s2777_s7] sm:$0xff]  }
0x1043   :  { %v682_v58 = vpop.permute.xlu1 %681 }
0x1044   :  { %684 = vst.msk [vmem:[#allocation4] sm:$0xff] %vm45_vm2, %v682_v58 }
0x104b   :  { %v745_v59 = vld [vmem:[#allocation4] sm:$0xff] }
0x104c   :  { %747 = vrot.lane.b32.xlu1 %v745_v59, %s2202_s16 }
0x10b4   :  { %v687_v17 = vpop.permute.xlu0 %686 }
0x10b5   :  { %689 = vst.msk [vmem:[#allocation3] sm:$0xff] %vm45_vm2, %v687_v17  ;;  %690 = vst.msk [vmem:[%s2779_s9 + $0x28] sm:$0xff] %vm45_vm2, %v687_v17  ;;  %v2542_v17 = vld [vmem:[%s2777_s7 + $0x8] sm:$0xff]  }
0x10bc   :  { %v692_v61 = vld [vmem:[#allocation3] sm:$0xff]  ;;  %v889_v3 = vld [vmem:[%s2779_s9 + $0x28] sm:$0xff] }
0x10bd   :  { %v693_v62 = vpack.c.bf16 %v692_v61, %v692_v61  ;;  %v894_v9 = vpack.c.bf16 %v889_v3, %v888_v8  ;;  %v1773_v61 = vld [vmem:[%s2772_s2 + $0x8] sm:$0xff] }
0x10be   :  { %v748_v33 = vpop.permute.xlu1 %747 }
0x10bf   :  { %1921 = vmatmul.mubr.msk.bf16.vlgmr.msra.gmra.mrb[16].mxu0 %vm45_vm2, %v693_v62 }
0x10c0   :  { %1933 = vmatpush3.bf16.msra.mxu0 %v2020_v55  ;;  %1936 = vmatprep.mubr.msk.bf16.mxu0 %vm45_vm2, %v892_v1  ;;  %v1772_v1 = vld [vmem:[%s2771_s1 + $0x8] sm:$0xff] }
0x10c1   :  { %1934 = vmatprep.subr.bf16.mxu0 %v2021_v0 }
0x10c4   :  { %1935 = vmatpush3.bf16.msra.mxu0 %v2021_v0 }
0x10c5   :  { %1960 = vmatprep.subr.bf16.mxu0 %v2200_v4 }
0x10c7   :  { %1937 = vmatmul.mubr.msk.bf16.vlgmr.msra.gmra.mrb[20].mxu0 %vm45_vm2, %v893_v7 }
0x10c8   :  { %1940 = vmatprep.mubr.msk.bf16.mxu0 %vm45_vm2, %v894_v9  ;;  %1961 = vmatpush3.bf16.msra.mxu0 %v2536_v57 }
0x10c9   :  { %1962 = vmatprep.subr.bf16.mxu0 %v2200_v4 }
0x10cc   :  { %1963 = vmatpush3.bf16.msra.mxu0 %v2542_v17 }
0x10cd   :  { %1976 = vmatprep.subr.bf16.mxu0 %v2200_v4 }
0x1192   :  { %v731_v12 = vpop.f32.mrb[16].mxu0 }
0x1193   :  { %v737_v20 = vadd.f32 %v731_v12, %v143_v11  ;;  %v1922_v21 = vpop.f32.mrb[17].mxu0 }
0x1194   :  { %v734_v22 = vpop.f32.mrb[18].mxu0 }
0x1195   :  { %2072 = vtanh.f32 %v737_v20  ;;  %v1923_v23 = vpop.f32.mrb[19].mxu0  ;;  %v1769_v29 = vmul.f32 -1.442695, %v737_v20  ;;  %v2596_v22 = vld [vmem:[%s2778_s8] ss:$0 sm:$0xff] }
0x1197   :  { %2074 = vpow2.f32 %v1769_v29 }
0x119a   :  { %v2504_v24 = vpop.f32.mrb[20].mxu0 }
0x119b   :  { %v2506_v25 = vpop.f32.mrb[21].mxu0 }
0x119c   :  { %v2508_v26 = vpop.f32.mrb[22].mxu0  ;;  %v961_v23 = vadd.f32 %v2596_v22, %v2506_v25 }
0x119d   :  { %v2510_v27 = vpop.f32.mrb[23].mxu0 }
0x119f   :  { %v2073_v28 = vpop.eup %2072 }
0x11a0   :  { %752 = vrot.lane.b32.xlu0 %v2073_v28, %s2202_s16 }
0x11a1   :  { %v2075_v13 = vpop.eup %2074 }
0x11a2   :  { %v741_v14 = vadd.f32 1.0, %v2075_v13 }
0x11a4   :  { %2076 = vrcp.f32 %v741_v14 }
0x11ae   :  { %v2077_v30 = vpop.eup %2076 }
0x11af   :  { %v750_v34 = vmul.f32 %v2077_v30, %v748_v33 }
0x1212   :  { %v753_v31 = vpop.permute.xlu0 %752 }
0x1213   :  { %v755_v32 = vmul.f32 %v2077_v30, %v753_v31 }
0x1215   :  { %757 = vrot.lane.b32.xlu0 %v755_v32, %s2202_s16 }
0x1287   :  { %v758_v35 = vpop.permute.xlu0 %757 }
0x1288   :  { %v760_v15 = vadd.f32 %v758_v35, %v750_v34 }
0x128a   :  { %2078 = vtanh.f32 %v760_v15 }
0x1294   :  { %v2079_v36 = vpop.eup %2078 }
0x1295   :  { %763 = vrot.lane.b32.xlu1 %v2079_v36, %s2202_s16 }
0x1299   :  { %768 = vrot.lane.b32.xlu1 %v760_v15, %s2203_s5 }
0x1307   :  { %v764_v37 = vpop.permute.xlu1 %763 }
0x1308   :  { %v766_v38 = vmul.f32 %v2077_v30, %v764_v37 }
0x130a   :  { %773 = vrot.lane.b32.xlu0 %v766_v38, %s2204_s17 }
0x130b   :  { %v769_v39 = vpop.permute.xlu1 %768 }
0x130c   :  { %771 = vst.msk [vmem:[#allocation4] sm:$0xff] %vm45_vm2, %v769_v39 }
0x1313   :  { %v832_v40 = vld [vmem:[#allocation4] sm:$0xff] }
0x1314   :  { %834 = vrot.lane.b32.xlu1 %v832_v40, %s2202_s16 }
0x137c   :  { %v774_v41 = vpop.permute.xlu0 %773 }
0x137d   :  { %776 = vst.msk [vmem:[#allocation3] sm:$0xff] %vm45_vm2, %v774_v41  ;;  %777 = vst.msk [vmem:[%s2779_s9 + $0x30] sm:$0xff] %vm45_vm2, %v774_v41 }
0x1384   :  { %v779_v42 = vld [vmem:[#allocation3] sm:$0xff] }
0x1385   :  { %v780_v43 = vpack.c.bf16 %v779_v42, %v779_v42  ;;  %v890_v3 = vld [vmem:[%s2779_s9 + $0x30] sm:$0xff] }
0x1386   :  { %v835_v19 = vpop.permute.xlu1 %834 }
0x1387   :  { %1929 = vmatmul.mubr.msk.bf16.vlgmr.msra.gmra.mrb[16].mxu1 %vm45_vm2, %v780_v43 }
0x1388   :  { %1948 = vmatprep.mubr.msk.bf16.mxu1 %vm2201_vm3, %v2200_v4  ;;  %1945 = vmatpush3.bf16.msra.mxu1 %v2536_v57 }
0x1389   :  { %1946 = vmatprep.subr.bf16.mxu1 %v2200_v4 }
0x138c   :  { %1947 = vmatpush3.bf16.msra.mxu1 %v2542_v17 }
0x138d   :  { %1952 = vmatprep.subr.bf16.mxu1 %v2200_v4 }
0x145a   :  { %v818_v45 = vpop.f32.mrb[16].mxu1 }
0x145b   :  { %v824_v46 = vadd.f32 %v818_v45, %v146_v44  ;;  %v1930_v6 = vpop.f32.mrb[17].mxu1 }
0x145c   :  { %v821_v47 = vpop.f32.mrb[18].mxu1 }
0x145d   :  { %2080 = vtanh.f32 %v824_v46  ;;  %v1931_v48 = vpop.f32.mrb[19].mxu1  ;;  %v1771_v49 = vmul.f32 -1.442695, %v824_v46  ;;  %v964_v47 = vadd.f32 %v2596_v22, %v2510_v27 }
0x145f   :  { %2082 = vpow2.f32 %v1771_v49 }
0x1467   :  { %v2081_v10 = vpop.eup %2080 }
0x1468   :  { %839 = vrot.lane.b32.xlu0 %v2081_v10, %s2202_s16 }
0x1469   :  { %v2083_v50 = vpop.eup %2082 }
0x146a   :  { %v828_v18 = vadd.f32 1.0, %v2083_v50 }
0x146c   :  { %2084 = vrcp.f32 %v828_v18 }
0x1476   :  { %v2085_v51 = vpop.eup %2084 }
0x1477   :  { %v837_v16 = vmul.f32 %v2085_v51, %v835_v19 }
0x14da   :  { %v840_v52 = vpop.permute.xlu0 %839 }
0x14db   :  { %v842_v53 = vmul.f32 %v2085_v51, %v840_v52 }
0x14dd   :  { %844 = vrot.lane.b32.xlu0 %v842_v53, %s2202_s16 }
0x154f   :  { %v845_v54 = vpop.permute.xlu0 %844 }
0x1550   :  { %v847_v55 = vadd.f32 %v845_v54, %v837_v16 }
0x1552   :  { %2086 = vtanh.f32 %v847_v55 }
0x155c   :  { %v2087_v56 = vpop.eup %2086 }
0x155d   :  { %850 = vrot.lane.b32.xlu1 %v2087_v56, %s2202_s16 }
0x1561   :  { %855 = vrot.lane.b32.xlu1 %v847_v55, %s2203_s5 }
0x15cf   :  { %v851_v58 = vpop.permute.xlu1 %850 }
0x15d0   :  { %v853_v59 = vmul.f32 %v2085_v51, %v851_v58 }
0x15d2   :  { %860 = vrot.lane.b32.xlu0 %v853_v59, %s2204_s17 }
0x15d3   :  { %v856_v60 = vpop.permute.xlu1 %855 }
0x15d4   :  { %858 = vst.msk [vmem:[#allocation4] sm:$0xff] %vm45_vm2, %v856_v60 }
0x15db   :  { %v867_v62 = vld [vmem:[#allocation4] sm:$0xff] }
0x15dc   :  { %883 = vst.msk [vmem:[#allocation4] sm:$0xff] %vm45_vm2, %v1773_v61  ;;  %868 = vst.msk [vmem:[#allocation7] sm:$0xff] %vm45_vm2, %v867_v62 }
0x15e3   :  { %v1065_v63 = vld [vmem:[#allocation4] sm:$0xff] }
0x15e4   :  { %1067 = vrot.lane.b32.xlu1 %v1065_v63, %s2202_s16 }
0x1644   :  { %v861_v0 = vpop.permute.xlu0 %860 }
0x1645   :  { %863 = vst.msk [vmem:[#allocation3] sm:$0xff] %vm45_vm2, %v861_v0  ;;  %864 = vst.msk [vmem:[%s2779_s9 + $0x38] sm:$0xff] %vm45_vm2, %v861_v0 }
0x164c   :  { %v865_v2 = vld [vmem:[#allocation3] sm:$0xff]  ;;  %v891_v5 = vld [vmem:[%s2779_s9 + $0x38] sm:$0xff] }
0x164d   :  { %880 = vst.msk [vmem:[#allocation3] sm:$0xff] %vm45_vm2, %v1772_v1  ;;  %866 = vst.msk [vmem:[#allocation5] sm:$0xff] %vm45_vm2, %v865_v2  ;;  %v895_v7 = vpack.c.bf16 %v891_v5, %v890_v3  ;;  %v969_v5 = vadd.f32 %v2504_v24, %v2596_v22 }
0x164f   :  { %1941 = vmatmul.mubr.msk.bf16.gmra.mrb[24].mxu0 %vm45_vm2, %v895_v7 }
0x1650   :  { %1964 = vmatprep.mubr.msk.bf16.mxu0 %vm2201_vm3, %v2200_v4 }
0x1654   :  { %v1000_v8 = vld [vmem:[#allocation3] sm:$0xff] }
0x1655   :  { %v1001_v9 = vpack.c.bf16 %v1000_v8, %v1000_v8 }
0x1656   :  { %v1068_v25 = vpop.permute.xlu1 %1067 }
0x1657   :  { %1949 = vmatmul.mubr.msk.bf16.vlgmr.msra.gmra.mrb[20].mxu1 %vm45_vm2, %v1001_v9 }
0x1658   :  { %1953 = vmatpush3.bf16.msra.mxu1 %v2536_v57  ;;  %1956 = vmatprep.mubr.msk.bf16.mxu1 %vm2201_vm3, %v2200_v4 }
0x1659   :  { %1954 = vmatprep.subr.bf16.mxu1 %v2200_v4 }
0x165c   :  { %1955 = vmatpush3.bf16.msra.mxu1 %v2542_v17 }
0x165d   :  { %1968 = vmatprep.subr.bf16.mxu1 %v2200_v4 }
0x1722   :  { %v2585_v11 = vpop.f32.mrb[24].mxu0 }
0x1723   :  { %v2587_v12 = vpop.f32.mrb[25].mxu0 }
0x1724   :  { %v2589_v20 = vpop.f32.mrb[26].mxu0 }
0x1725   :  { %v2591_v21 = vpop.f32.mrb[27].mxu0 }
0x172a   :  { %v1051_v28 = vpop.f32.mrb[20].mxu1 }
0x172b   :  { %v1057_v29 = vadd.f32 %v1051_v28, %v961_v23  ;;  %v1950_v13 = vpop.f32.mrb[21].mxu1 }
0x172c   :  { %v1054_v14 = vpop.f32.mrb[22].mxu1 }
0x172d   :  { %2088 = vtanh.f32 %v1057_v29  ;;  %v1951_v30 = vpop.f32.mrb[23].mxu1  ;;  %v1784_v32 = vmul.f32 -1.442695, %v1057_v29 }
0x172f   :  { %2090 = vpow2.f32 %v1784_v32 }
0x1737   :  { %v2089_v31 = vpop.eup %2088 }
0x1738   :  { %1072 = vrot.lane.b32.xlu0 %v2089_v31, %s2202_s16 }
0x1739   :  { %v2091_v33 = vpop.eup %2090 }
0x173a   :  { %v1061_v34 = vadd.f32 1.0, %v2091_v33 }
0x173c   :  { %2092 = vrcp.f32 %v1061_v34 }
0x1746   :  { %v2093_v35 = vpop.eup %2092 }
0x1747   :  { %v1070_v37 = vmul.f32 %v2093_v35, %v1068_v25 }
0x17aa   :  { %v1073_v15 = vpop.permute.xlu0 %1072 }
0x17ab   :  { %v1075_v36 = vmul.f32 %v2093_v35, %v1073_v15 }
0x17ad   :  { %1077 = vrot.lane.b32.xlu0 %v1075_v36, %s2202_s16 }
0x181f   :  { %v1078_v38 = vpop.permute.xlu0 %1077 }
0x1820   :  { %v1080_v39 = vadd.f32 %v1078_v38, %v1070_v37 }
0x1822   :  { %2094 = vtanh.f32 %v1080_v39 }
0x182c   :  { %v2095_v40 = vpop.eup %2094 }
0x182d   :  { %1083 = vrot.lane.b32.xlu1 %v2095_v40, %s2202_s16 }
0x1831   :  { %1088 = vrot.lane.b32.xlu1 %v1080_v39, %s2203_s5 }
0x189f   :  { %v1084_v41 = vpop.permute.xlu1 %1083 }
0x18a0   :  { %v1086_v42 = vmul.f32 %v2093_v35, %v1084_v41 }
0x18a2   :  { %1093 = vrot.lane.b32.xlu0 %v1086_v42, %s2204_s17 }
0x18a3   :  { %v1089_v43 = vpop.permute.xlu1 %1088 }
0x18a4   :  { %1091 = vst.msk [vmem:[#allocation4] sm:$0xff] %vm45_vm2, %v1089_v43  ;;  %v972_v43 = vadd.f32 %v2508_v26, %v2596_v22 }
0x18ab   :  { %v1152_v44 = vld [vmem:[#allocation4] sm:$0xff] }
0x18ac   :  { %1154 = vrot.lane.b32.xlu1 %v1152_v44, %s2202_s16 }
0x1914   :  { %v1094_v45 = vpop.permute.xlu0 %1093 }
0x1915   :  { %1096 = vst.msk [vmem:[#allocation3] sm:$0xff] %vm45_vm2, %v1094_v45  ;;  %1097 = vst.msk [vmem:[%s2779_s9] sm:$0xff] %vm45_vm2, %v1094_v45 }
0x191c   :  { %v1099_v46 = vld [vmem:[#allocation3] sm:$0xff] }
0x191d   :  { %v1100_v6 = vpack.c.bf16 %v1099_v46, %v1099_v46 }
0x191e   :  { %v1155_v27 = vpop.permute.xlu1 %1154 }
0x191f   :  { %1957 = vmatmul.mubr.msk.bf16.vlgmr.msra.gmra.mrb[24].mxu1 %vm45_vm2, %v1100_v6 }
0x1920   :  { %1969 = vmatpush3.bf16.msra.mxu1 %v2536_v57  ;;  %1972 = vmatprep.mubr.msk.bf16.mxu1 %vm2201_vm3, %v2200_v4 }
0x1921   :  { %1970 = vmatprep.subr.bf16.mxu1 %v2200_v4 }
0x1924   :  { %1971 = vmatpush3.bf16.msra.mxu1 %v2542_v17 }
0x1925   :  { %1984 = vmatprep.subr.bf16.mxu1 %v2200_v4 }
0x19f2   :  { %v1138_v48 = vpop.f32.mrb[24].mxu1 }
0x19f3   :  { %v1144_v10 = vadd.f32 %v1138_v48, %v964_v47  ;;  %v1958_v49 = vpop.f32.mrb[25].mxu1 }
0x19f4   :  { %v1141_v50 = vpop.f32.mrb[26].mxu1 }
0x19f5   :  { %2096 = vtanh.f32 %v1144_v10  ;;  %v1959_v18 = vpop.f32.mrb[27].mxu1  ;;  %v1786_v52 = vmul.f32 -1.442695, %v1144_v10 }
0x19f7   :  { %2098 = vpow2.f32 %v1786_v52 }
0x19ff   :  { %v2097_v51 = vpop.eup %2096 }
0x1a00   :  { %1159 = vrot.lane.b32.xlu0 %v2097_v51, %s2202_s16 }
0x1a01   :  { %v2099_v53 = vpop.eup %2098 }
0x1a02   :  { %v1148_v19 = vadd.f32 1.0, %v2099_v53 }
0x1a04   :  { %2100 = vrcp.f32 %v1148_v19 }
0x1a0e   :  { %v2101_v16 = vpop.eup %2100 }
0x1a0f   :  { %v1157_v56 = vmul.f32 %v2101_v16, %v1155_v27 }
0x1a72   :  { %v1160_v54 = vpop.permute.xlu0 %1159 }
0x1a73   :  { %v1162_v55 = vmul.f32 %v2101_v16, %v1160_v54 }
0x1a75   :  { %1164 = vrot.lane.b32.xlu0 %v1162_v55, %s2202_s16 }
0x1ae7   :  { %v1165_v58 = vpop.permute.xlu0 %1164 }
0x1ae8   :  { %v1167_v59 = vadd.f32 %v1165_v58, %v1157_v56 }
0x1aea   :  { %2102 = vtanh.f32 %v1167_v59 }
0x1af4   :  { %v2103_v60 = vpop.eup %2102 }
0x1af5   :  { %1170 = vrot.lane.b32.xlu1 %v2103_v60, %s2202_s16 }
0x1af9   :  { %1175 = vrot.lane.b32.xlu1 %v1167_v59, %s2203_s5 }
0x1b67   :  { %v1171_v61 = vpop.permute.xlu1 %1170 }
0x1b68   :  { %v1173_v62 = vmul.f32 %v2101_v16, %v1171_v61 }
0x1b6a   :  { %1180 = vrot.lane.b32.xlu0 %v1173_v62, %s2204_s17  ;;  %v977_v62 = vadd.f32 %v2596_v22, %v2587_v12 }
0x1b6b   :  { %v1176_v63 = vpop.permute.xlu1 %1175 }
0x1b6c   :  { %1178 = vst.msk [vmem:[#allocation4] sm:$0xff] %vm45_vm2, %v1176_v63 }
0x1b73   :  { %v1239_v0 = vld [vmem:[#allocation4] sm:$0xff] }
0x1b74   :  { %1241 = vrot.lane.b32.xlu1 %v1239_v0, %s2202_s16 }
0x1bdc   :  { %v1181_v1 = vpop.permute.xlu0 %1180 }
0x1bdd   :  { %1183 = vst.msk [vmem:[#allocation3] sm:$0xff] %vm45_vm2, %v1181_v1  ;;  %1184 = vst.msk [vmem:[%s2779_s9 + $0x8] sm:$0xff] %vm45_vm2, %v1181_v1 }
0x1be4   :  { %v1186_v2 = vld [vmem:[#allocation3] sm:$0xff] }
0x1be5   :  { %v1187_v3 = vpack.c.bf16 %v1186_v2, %v1186_v2 }
0x1be6   :  { %v1242_v24 = vpop.permute.xlu1 %1241 }
0x1be7   :  { %1965 = vmatmul.mubr.msk.bf16.vlgmr.msra.gmra.mrb[28].mxu0 %vm45_vm2, %v1187_v3 }
0x1be8   :  { %1977 = vmatpush3.bf16.msra.mxu0 %v2536_v57  ;;  %1980 = vmatprep.mubr.msk.bf16.mxu0 %vm2201_vm3, %v2200_v4 }
0x1be9   :  { %1978 = vmatprep.subr.bf16.mxu0 %v2200_v4 }
0x1bec   :  { %1979 = vmatpush3.bf16.msra.mxu0 %v2542_v17 }
0x1bed   :  { %1992 = vmatprep.subr.bf16.mxu0 %v2200_v4 }
0x1cba   :  { %v1225_v7 = vpop.f32.mrb[28].mxu0 }
0x1cbb   :  { %v1231_v8 = vadd.f32 %v1225_v7, %v969_v5  ;;  %v1966_v9 = vpop.f32.mrb[29].mxu0 }
0x1cbc   :  { %v1228_v23 = vpop.f32.mrb[30].mxu0 }
0x1cbd   :  { %2104 = vtanh.f32 %v1231_v8  ;;  %v1967_v28 = vpop.f32.mrb[31].mxu0  ;;  %v1788_v13 = vmul.f32 -1.442695, %v1231_v8 }
0x1cbf   :  { %2106 = vpow2.f32 %v1788_v13 }
0x1cc7   :  { %v2105_v29 = vpop.eup %2104 }
0x1cc8   :  { %1246 = vrot.lane.b32.xlu0 %v2105_v29, %s2202_s16 }
0x1cc9   :  { %v2107_v14 = vpop.eup %2106 }
0x1cca   :  { %v1235_v30 = vadd.f32 1.0, %v2107_v14 }
0x1ccc   :  { %2108 = vrcp.f32 %v1235_v30 }
0x1cd6   :  { %v2109_v31 = vpop.eup %2108 }
0x1cd7   :  { %v1244_v34 = vmul.f32 %v2109_v31, %v1242_v24 }
0x1d3a   :  { %v1247_v32 = vpop.permute.xlu0 %1246 }
0x1d3b   :  { %v1249_v33 = vmul.f32 %v2109_v31, %v1247_v32 }
0x1d3d   :  { %1251 = vrot.lane.b32.xlu0 %v1249_v33, %s2202_s16 }
0x1daf   :  { %v1252_v35 = vpop.permute.xlu0 %1251 }
0x1db0   :  { %v1254_v15 = vadd.f32 %v1252_v35, %v1244_v34 }
0x1db2   :  { %2110 = vtanh.f32 %v1254_v15 }
0x1dbc   :  { %v2111_v36 = vpop.eup %2110 }
0x1dbd   :  { %1257 = vrot.lane.b32.xlu1 %v2111_v36, %s2202_s16 }
0x1dc1   :  { %1262 = vrot.lane.b32.xlu1 %v1254_v15, %s2203_s5 }
0x1e2f   :  { %v1258_v25 = vpop.permute.xlu1 %1257 }
0x1e30   :  { %v1260_v37 = vmul.f32 %v2109_v31, %v1258_v25  ;;  %v980_v25 = vadd.f32 %v2596_v22, %v2591_v21 }
0x1e32   :  { %1267 = vrot.lane.b32.xlu0 %v1260_v37, %s2204_s17 }
0x1e33   :  { %v1263_v38 = vpop.permute.xlu1 %1262 }
0x1e34   :  { %1265 = vst.msk [vmem:[#allocation4] sm:$0xff] %vm45_vm2, %v1263_v38 }
0x1e3b   :  { %v1326_v39 = vld [vmem:[#allocation4] sm:$0xff] }
0x1e3c   :  { %1328 = vrot.lane.b32.xlu1 %v1326_v39, %s2202_s16 }
0x1ea4   :  { %v1268_v40 = vpop.permute.xlu0 %1267 }
0x1ea5   :  { %1270 = vst.msk [vmem:[#allocation3] sm:$0xff] %vm45_vm2, %v1268_v40  ;;  %1271 = vst.msk [vmem:[%s2779_s9 + $0x10] sm:$0xff] %vm45_vm2, %v1268_v40 }
0x1eac   :  { %v1273_v41 = vld [vmem:[#allocation3] sm:$0xff] }
0x1ead   :  { %v1274_v42 = vpack.c.bf16 %v1273_v41, %v1273_v41 }
0x1eae   :  { %v1329_v26 = vpop.permute.xlu1 %1328 }
0x1eaf   :  { %1973 = vmatmul.mubr.msk.bf16.vlgmr.msra.gmra.mrb[28].mxu1 %vm45_vm2, %v1274_v42 }
0x1eb0   :  { %1985 = vmatpush3.bf16.msra.mxu1 %v2536_v57  ;;  %1988 = vmatprep.mubr.msk.bf16.mxu1 %vm2201_vm3, %v2200_v4 }
0x1eb1   :  { %1986 = vmatprep.subr.bf16.mxu1 %v2200_v4 }
0x1eb4   :  { %1987 = vmatpush3.bf16.msra.mxu1 %v2542_v17 }
0x1eb5   :  { %2000 = vmatprep.subr.bf16.mxu1 %v2200_v4 }
0x1f82   :  { %v1312_v44 = vpop.f32.mrb[28].mxu1 }
0x1f83   :  { %v1318_v45 = vadd.f32 %v1312_v44, %v972_v43  ;;  %v1974_v46 = vpop.f32.mrb[29].mxu1 }
0x1f84   :  { %v1315_v6 = vpop.f32.mrb[30].mxu1 }
0x1f85   :  { %2112 = vtanh.f32 %v1318_v45  ;;  %v1975_v47 = vpop.f32.mrb[31].mxu1  ;;  %v1790_v10 = vmul.f32 -1.442695, %v1318_v45 }
0x1f87   :  { %2114 = vpow2.f32 %v1790_v10 }
0x1f8f   :  { %v2113_v48 = vpop.eup %2112 }
0x1f90   :  { %1333 = vrot.lane.b32.xlu0 %v2113_v48, %s2202_s16 }
0x1f91   :  { %v2115_v49 = vpop.eup %2114 }
0x1f92   :  { %v1322_v50 = vadd.f32 1.0, %v2115_v49 }
0x1f94   :  { %2116 = vrcp.f32 %v1322_v50 }
0x1f9e   :  { %v2117_v18 = vpop.eup %2116 }
0x1f9f   :  { %v1331_v53 = vmul.f32 %v2117_v18, %v1329_v26 }
0x2002   :  { %v1334_v51 = vpop.permute.xlu0 %1333 }
0x2003   :  { %v1336_v52 = vmul.f32 %v2117_v18, %v1334_v51 }
0x2005   :  { %1338 = vrot.lane.b32.xlu0 %v1336_v52, %s2202_s16 }
0x2077   :  { %v1339_v19 = vpop.permute.xlu0 %1338 }
0x2078   :  { %v1341_v16 = vadd.f32 %v1339_v19, %v1331_v53  ;;  %v985_v53 = vadd.f32 %v2585_v11, %v2596_v22 }
0x207a   :  { %2118 = vtanh.f32 %v1341_v16 }
0x2084   :  { %v2119_v54 = vpop.eup %2118 }
0x2085   :  { %1344 = vrot.lane.b32.xlu1 %v2119_v54, %s2202_s16 }
0x2089   :  { %1349 = vrot.lane.b32.xlu1 %v1341_v16, %s2203_s5 }
0x20f7   :  { %v1345_v55 = vpop.permute.xlu1 %1344 }
0x20f8   :  { %v1347_v27 = vmul.f32 %v2117_v18, %v1345_v55 }
0x20fa   :  { %1354 = vrot.lane.b32.xlu0 %v1347_v27, %s2204_s17 }
0x20fb   :  { %v1350_v56 = vpop.permute.xlu1 %1349 }
0x20fc   :  { %1352 = vst.msk [vmem:[#allocation4] sm:$0xff] %vm45_vm2, %v1350_v56 }
0x2103   :  { %v1413_v58 = vld [vmem:[#allocation4] sm:$0xff] }
0x2104   :  { %1415 = vrot.lane.b32.xlu1 %v1413_v58, %s2202_s16 }
0x216c   :  { %v1355_v59 = vpop.permute.xlu0 %1354 }
0x216d   :  { %1357 = vst.msk [vmem:[#allocation3] sm:$0xff] %vm45_vm2, %v1355_v59  ;;  %1358 = vst.msk [vmem:[%s2779_s9 + $0x18] sm:$0xff] %vm45_vm2, %v1355_v59 }
0x2174   :  { %v1360_v60 = vld [vmem:[#allocation3] sm:$0xff] }
0x2175   :  { %v1361_v61 = vpack.c.bf16 %v1360_v60, %v1360_v60 }
0x2176   :  { %v1416_v12 = vpop.permute.xlu1 %1415 }
0x2177   :  { %1981 = vmatmul.mubr.msk.bf16.vlgmr.msra.gmra.mrb[32].mxu0 %vm45_vm2, %v1361_v61 }
0x2178   :  { %1993 = vmatpush3.bf16.msra.mxu0 %v2536_v57  ;;  %1996 = vmatprep.mubr.msk.bf16.mxu0 %vm2201_vm3, %v2200_v4 }
0x2179   :  { %1994 = vmatprep.subr.bf16.mxu0 %v2200_v4 }
0x217c   :  { %1995 = vmatpush3.bf16.msra.mxu0 %v2542_v17 }
0x224a   :  { %v1399_v63 = vpop.f32.mrb[32].mxu0 }
0x224b   :  { %v1405_v0 = vadd.f32 %v1399_v63, %v977_v62  ;;  %v1982_v1 = vpop.f32.mrb[33].mxu0 }
0x224c   :  { %v1402_v2 = vpop.f32.mrb[34].mxu0 }
0x224d   :  { %2120 = vtanh.f32 %v1405_v0  ;;  %v1983_v3 = vpop.f32.mrb[35].mxu0  ;;  %v1792_v7 = vmul.f32 -1.442695, %v1405_v0 }
0x224f   :  { %2122 = vpow2.f32 %v1792_v7 }
0x2257   :  { %v2121_v5 = vpop.eup %2120 }
0x2258   :  { %1420 = vrot.lane.b32.xlu0 %v2121_v5, %s2202_s16 }
0x2259   :  { %v2123_v8 = vpop.eup %2122 }
0x225a   :  { %v1409_v9 = vadd.f32 1.0, %v2123_v8 }
0x225c   :  { %2124 = vrcp.f32 %v1409_v9 }
0x2266   :  { %v2125_v23 = vpop.eup %2124 }
0x2267   :  { %v1418_v13 = vmul.f32 %v2125_v23, %v1416_v12  ;;  %v988_v12 = vadd.f32 %v2589_v20, %v2596_v22 }
0x22ca   :  { %v1421_v28 = vpop.permute.xlu0 %1420 }
0x22cb   :  { %v1423_v29 = vmul.f32 %v2125_v23, %v1421_v28 }
0x22cd   :  { %1425 = vrot.lane.b32.xlu0 %v1423_v29, %s2202_s16 }
0x233f   :  { %v1426_v14 = vpop.permute.xlu0 %1425 }
0x2340   :  { %v1428_v30 = vadd.f32 %v1426_v14, %v1418_v13 }
0x2342   :  { %2126 = vtanh.f32 %v1428_v30 }
0x234c   :  { %v2127_v31 = vpop.eup %2126 }
0x234d   :  { %1431 = vrot.lane.b32.xlu1 %v2127_v31, %s2202_s16 }
0x2351   :  { %1436 = vrot.lane.b32.xlu1 %v1428_v30, %s2203_s5 }
0x23bf   :  { %v1432_v32 = vpop.permute.xlu1 %1431 }
0x23c0   :  { %v1434_v33 = vmul.f32 %v2125_v23, %v1432_v32 }
0x23c2   :  { %1441 = vrot.lane.b32.xlu0 %v1434_v33, %s2204_s17 }
0x23c3   :  { %v1437_v24 = vpop.permute.xlu1 %1436 }
0x23c4   :  { %1439 = vst.msk [vmem:[#allocation4] sm:$0xff] %vm45_vm2, %v1437_v24 }
0x23cb   :  { %v1500_v34 = vld [vmem:[#allocation4] sm:$0xff] }
0x23cc   :  { %1502 = vrot.lane.b32.xlu1 %v1500_v34, %s2202_s16 }
0x2434   :  { %v1442_v35 = vpop.permute.xlu0 %1441 }
0x2435   :  { %1444 = vst.msk [vmem:[#allocation3] sm:$0xff] %vm45_vm2, %v1442_v35  ;;  %1445 = vst.msk [vmem:[%s2779_s9 + $0x20] sm:$0xff] %vm45_vm2, %v1442_v35 }
0x243c   :  { %v1447_v15 = vld [vmem:[#allocation3] sm:$0xff] }
0x243d   :  { %v1448_v36 = vpack.c.bf16 %v1447_v15, %v1447_v15 }
0x243e   :  { %v1503_v21 = vpop.permute.xlu1 %1502 }
0x243f   :  { %1989 = vmatmul.mubr.msk.bf16.vlgmr.msra.gmra.mrb[32].mxu1 %vm45_vm2, %v1448_v36 }
0x2440   :  { %2001 = vmatpush3.bf16.msra.mxu1 %v2536_v57  ;;  %2004 = vmatprep.mubr.msk.bf16.mxu1 %vm2201_vm3, %v2200_v4 }
0x2441   :  { %2002 = vmatprep.subr.bf16.mxu1 %v2200_v4 }
0x2444   :  { %2003 = vmatpush3.bf16.msra.mxu1 %v2542_v17 }
0x2512   :  { %v1486_v37 = vpop.f32.mrb[32].mxu1 }
0x2513   :  { %v1492_v38 = vadd.f32 %v1486_v37, %v980_v25  ;;  %v1990_v39 = vpop.f32.mrb[33].mxu1 }
0x2514   :  { %v1489_v40 = vpop.f32.mrb[34].mxu1 }
0x2515   :  { %2128 = vtanh.f32 %v1492_v38  ;;  %v1991_v41 = vpop.f32.mrb[35].mxu1  ;;  %v1794_v57 = vmul.f32 -1.442695, %v1492_v38 }
0x2517   :  { %2130 = vpow2.f32 %v1794_v57 }
0x251f   :  { %v2129_v42 = vpop.eup %2128 }
0x2520   :  { %1507 = vrot.lane.b32.xlu0 %v2129_v42, %s2202_s16 }
0x2521   :  { %v2131_v43 = vpop.eup %2130 }
0x2522   :  { %v1496_v44 = vadd.f32 1.0, %v2131_v43 }
0x2524   :  { %2132 = vrcp.f32 %v1496_v44 }
0x252e   :  { %v2133_v4 = vpop.eup %2132 }
0x252f   :  { %v1505_v46 = vmul.f32 %v2133_v4, %v1503_v21 }
0x2592   :  { %v1508_v45 = vpop.permute.xlu0 %1507 }
0x2593   :  { %v1510_v17 = vmul.f32 %v2133_v4, %v1508_v45 }
0x2595   :  { %1512 = vrot.lane.b32.xlu0 %v1510_v17, %s2202_s16 }
0x2607   :  { %v1513_v6 = vpop.permute.xlu0 %1512 }
0x2608   :  { %v1515_v47 = vadd.f32 %v1513_v6, %v1505_v46 }
0x260a   :  { %2134 = vtanh.f32 %v1515_v47 }
0x2614   :  { %v2135_v48 = vpop.eup %2134 }
0x2615   :  { %1518 = vrot.lane.b32.xlu1 %v2135_v48, %s2202_s16 }
0x2619   :  { %1523 = vrot.lane.b32.xlu1 %v1515_v47, %s2203_s5 }
0x2687   :  { %v1519_v10 = vpop.permute.xlu1 %1518 }
0x2688   :  { %v1521_v49 = vmul.f32 %v2133_v4, %v1519_v10 }
0x268a   :  { %1528 = vrot.lane.b32.xlu0 %v1521_v49, %s2204_s17 }
0x268b   :  { %v1524_v50 = vpop.permute.xlu1 %1523 }
0x268c   :  { %1526 = vst.msk [vmem:[#allocation4] sm:$0xff] %vm45_vm2, %v1524_v50 }
0x2693   :  { %v1587_v18 = vld [vmem:[#allocation4] sm:$0xff] }
0x2694   :  { %1589 = vrot.lane.b32.xlu1 %v1587_v18, %s2202_s16 }
0x26fc   :  { %v1529_v51 = vpop.permute.xlu0 %1528 }
0x26fd   :  { %1531 = vst.msk [vmem:[#allocation3] sm:$0xff] %vm45_vm2, %v1529_v51  ;;  %1532 = vst.msk [vmem:[%s2779_s9 + $0x28] sm:$0xff] %vm45_vm2, %v1529_v51 }
0x2704   :  { %v1534_v52 = vld [vmem:[#allocation3] sm:$0xff] }
0x2705   :  { %v1535_v26 = vpack.c.bf16 %v1534_v52, %v1534_v52 }
0x2706   :  { %v1590_v11 = vpop.permute.xlu1 %1589 }
0x2707   :  { %1997 = vmatmul.mubr.msk.bf16.vlgmr.msra.gmra.mrb[36].mxu0 %vm45_vm2, %v1535_v26 }
0x27da   :  { %v1573_v19 = vpop.f32.mrb[36].mxu0 }
0x27db   :  { %v1579_v16 = vadd.f32 %v1573_v19, %v985_v53  ;;  %v1998_v54 = vpop.f32.mrb[37].mxu0 }
0x27dc   :  { %v1576_v55 = vpop.f32.mrb[38].mxu0 }
0x27dd   :  { %2136 = vtanh.f32 %v1579_v16  ;;  %v1999_v27 = vpop.f32.mrb[39].mxu0  ;;  %v1796_v58 = vmul.f32 -1.442695, %v1579_v16 }
0x27df   :  { %2138 = vpow2.f32 %v1796_v58 }
0x27e7   :  { %v2137_v56 = vpop.eup %2136 }
0x27e8   :  { %1594 = vrot.lane.b32.xlu0 %v2137_v56, %s2202_s16 }
0x27e9   :  { %v2139_v59 = vpop.eup %2138 }
0x27ea   :  { %v1583_v60 = vadd.f32 1.0, %v2139_v59 }
0x27ec   :  { %2140 = vrcp.f32 %v1583_v60 }
0x27f6   :  { %v2141_v61 = vpop.eup %2140 }
0x27f7   :  { %v1592_v0 = vmul.f32 %v2141_v61, %v1590_v11 }
0x285a   :  { %v1595_v62 = vpop.permute.xlu0 %1594 }
0x285b   :  { %v1597_v63 = vmul.f32 %v2141_v61, %v1595_v62 }
0x285d   :  { %1599 = vrot.lane.b32.xlu0 %v1597_v63, %s2202_s16 }
0x28cf   :  { %v1600_v1 = vpop.permute.xlu0 %1599 }
0x28d0   :  { %v1602_v2 = vadd.f32 %v1600_v1, %v1592_v0 }
0x28d2   :  { %2142 = vtanh.f32 %v1602_v2 }
0x28dc   :  { %v2143_v3 = vpop.eup %2142 }
0x28dd   :  { %1605 = vrot.lane.b32.xlu1 %v2143_v3, %s2202_s16 }
0x28e1   :  { %1610 = vrot.lane.b32.xlu1 %v1602_v2, %s2203_s5 }
0x294f   :  { %v1606_v5 = vpop.permute.xlu1 %1605 }
0x2950   :  { %v1608_v7 = vmul.f32 %v2141_v61, %v1606_v5 }
0x2952   :  { %1615 = vrot.lane.b32.xlu0 %v1608_v7, %s2204_s17 }
0x2953   :  { %v1611_v8 = vpop.permute.xlu1 %1610 }
0x2954   :  { %1613 = vst.msk [vmem:[#allocation4] sm:$0xff] %vm45_vm2, %v1611_v8 }
0x295b   :  { %v1674_v9 = vld [vmem:[#allocation4] sm:$0xff] }
0x295c   :  { %1676 = vrot.lane.b32.xlu1 %v1674_v9, %s2202_s16 }
0x29c4   :  { %v1616_v23 = vpop.permute.xlu0 %1615 }
0x29c5   :  { %1618 = vst.msk [vmem:[#allocation3] sm:$0xff] %vm45_vm2, %v1616_v23  ;;  %1619 = vst.msk [vmem:[%s2779_s9 + $0x30] sm:$0xff] %vm45_vm2, %v1616_v23 }
0x29cc   :  { %v1621_v28 = vld [vmem:[#allocation3] sm:$0xff] }
0x29cd   :  { %v1622_v29 = vpack.c.bf16 %v1621_v28, %v1621_v28 }
0x29ce   :  { %v1677_v20 = vpop.permute.xlu1 %1676 }
0x29cf   :  { %2005 = vmatmul.mubr.msk.bf16.vlgmr.msra.gmra.mrb[36].mxu1 %vm45_vm2, %v1622_v29 }
0x2aa2   :  { %v1660_v13 = vpop.f32.mrb[36].mxu1 }
0x2aa3   :  { %v1666_v14 = vadd.f32 %v1660_v13, %v988_v12  ;;  %v2006_v30 = vpop.f32.mrb[37].mxu1 }
0x2aa4   :  { %v1663_v31 = vpop.f32.mrb[38].mxu1 }
0x2aa5   :  { %2144 = vtanh.f32 %v1666_v14  ;;  %v2007_v32 = vpop.f32.mrb[39].mxu1  ;;  %v1798_v24 = vmul.f32 -1.442695, %v1666_v14 }
0x2aa7   :  { %2146 = vpow2.f32 %v1798_v24 }
0x2aaf   :  { %v2145_v33 = vpop.eup %2144 }
0x2ab0   :  { %1681 = vrot.lane.b32.xlu0 %v2145_v33, %s2202_s16 }
0x2ab1   :  { %v2147_v34 = vpop.eup %2146 }
0x2ab2   :  { %v1670_v35 = vadd.f32 1.0, %v2147_v34 }
0x2ab4   :  { %2148 = vrcp.f32 %v1670_v35 }
0x2abe   :  { %v2149_v15 = vpop.eup %2148 }
0x2abf   :  { %v1679_v22 = vmul.f32 %v2149_v15, %v1677_v20 }
0x2b22   :  { %v1682_v36 = vpop.permute.xlu0 %1681 }
0x2b23   :  { %v1684_v25 = vmul.f32 %v2149_v15, %v1682_v36 }
0x2b25   :  { %1686 = vrot.lane.b32.xlu0 %v1684_v25, %s2202_s16 }
0x2b97   :  { %v1687_v37 = vpop.permute.xlu0 %1686 }
0x2b98   :  { %v1689_v38 = vadd.f32 %v1687_v37, %v1679_v22 }
0x2b9a   :  { %2150 = vtanh.f32 %v1689_v38  ;;  %1697 = vrot.lane.b32.xlu0 %v1689_v38, %s2203_s5 }
0x2ba4   :  { %v2151_v39 = vpop.eup %2150 }
0x2ba5   :  { %1692 = vrot.lane.b32.xlu1 %v2151_v39, %s2202_s16 }
0x2c0c   :  { %v1698_v40 = vpop.permute.xlu0 %1697 }
0x2c0d   :  { %1700 = vst.msk [vmem:[#allocation4] sm:$0xff] %vm45_vm2, %v1698_v40 }
0x2c14   :  { %v1710_v41 = vld [vmem:[#allocation4] sm:$0xff] }
0x2c15   :  { %1712 = vst.msk [vmem:[#allocation7 + $0x8] sm:$0xff] %vm45_vm2, %v1710_v41 }
0x2c17   :  { %v1693_v42 = vpop.permute.xlu1 %1692 }
0x2c18   :  { %2163 = shalt.err (!%p2160_p4)
}
0x2c19   :  { %s2164_s16 = scalar_lea.hbm %s2781_s11, 256 }
0x2c1a   :  { %p2165_p5 = scmp.ne.s32.totalorder %s2781_s11, %s2164_s16  ;;  %p2168_p6 = scmp.lt.u32.totalorder %s2164_s16, %s2781_s11 }
0x2c1c   :  { %p2170_p7 = pnand %p2168_p6, %p2165_p5 }
0x2c1e   :  { %2173 = shalt.err (!%p2170_p7)
}
0x2c1f   :  { %s2206_s25 = smov 128   ;;  %s2207_s1 = smov 8   ;;  %v1695_v57 = vmul.f32 %v2149_v15, %v1693_v42 }
0x2c20   :  { %1738 = dma.vmem_to_hbm [thread:$0]  %s1733_s20, 256, %s2781_s11, [#allocation8], %s2206_s25, %s2206_s25, %s2207_s1  }
0x2c21   :  { %1702 = vrot.lane.b32.xlu1 %v1695_v57, %s2204_s17  ;;  %s2208_s28 = smov [#allocation5]  }
0x2c22   :  { %s1720_s29 = sshll.u32 %s2208_s28, 4  ;;  %s1721_s29 = int_to_ptr.vmem [resolvable:$true] %s1720_s29 }
0x2c23   :  { %s2174_s6 = scalar_lea.vmem %s1721_s29, 256  ;;  %p2179_p9 = scmp.lt.s32.totalorder %s1721_s29, %s1721_s29 }
0x2c24   :  { %p2175_p8 = scmp.ne.s32.totalorder %s1721_s29, %s2174_s6  ;;  %p2180_p10 = scmp.lt.s32.totalorder %s2174_s6, %s2174_s6 }
0x2c26   :  { %p2181_p11 = por %p2180_p10, %p2179_p9 }
0x2c28   :  { %p2182_p12 = pnand %p2181_p11, %p2175_p8 }
0x2c93   :  { %v1703_v43 = vpop.permute.xlu1 %1702 }
0x2c94   :  { %1705 = vst.msk [vmem:[#allocation3] sm:$0xff] %vm45_vm2, %v1703_v43  ;;  %1706 = vst.msk [vmem:[%s2779_s9 + $0x38] sm:$0xff] %vm45_vm2, %v1703_v43 }
0x2c9b   :  { %v1707_v44 = vld [vmem:[#allocation3] sm:$0xff] }
0x2c9c   :  { %1709 = vst.msk [vmem:[#allocation5 + $0x8] sm:$0xff] %vm45_vm2, %v1707_v44 }
0x2c9d   :  { %2185 = shalt.err (!%p2182_p12)
}
0x2c9e   :  { %s2186_s30 = scalar_lea.hbm %s2780_s10, 256 }
0x2c9f   :  { %p2187_p13 = scmp.ne.s32.totalorder %s2780_s10, %s2186_s30  ;;  %p2190_p0 = scmp.lt.u32.totalorder %s2186_s30, %s2780_s10 }
0x2ca1   :  { %p2192_p1 = pnand %p2190_p0, %p2187_p13 }
0x2ca3   :  { %2195 = shalt.err (!%p2192_p1)
}
0x2ca4   :  { %1726 = dma.vmem_to_hbm [thread:$0]  %s1721_s29, 256, %s2780_s10, [#allocation6], %s2206_s25, %s2206_s25, %s2207_s1  }
0x2ca5   :  { %2196 = dma.done.wait [#allocation6], 256  }
0x2ca6   :  { %2197 = vsyncadd [#allocation6], 4294967040 }
0x2ca7   :  { %2198 = dma.done.wait [#allocation8], 256  }
0x2ca8   :  { %2199 = vsyncadd [#allocation8], 4294967040 }
0x2ca9   :  { %1747 = vsyncpa [#allocation6], 1 }
0x2caa   :  { %1748 = vsyncpa [#allocation8], 1 }

</bundles_post_ra>
